<compile_context>
chip_gen: v7x
topology: tpu7x:2x2x1
jax: 0.10.0
libtpu: 0.0.40
codegen_flags: <defaults>
</compile_context>

<pallas_src>
import functools

import jax
import jax.numpy as jnp
from jax.experimental import pallas as pl
from jax.experimental.pallas import tpu as pltpu

_VMEM_LIMIT_BYTES = 64 * 1024 * 1024    # explicit scoped-VMEM cap (>= every chip's default)
_VMEM_BUDGET_BYTES = 24 * 1024 * 1024   # target working set (fits v7x 32 MiB default / 64 MiB phys)


# ----------------------------- activation helpers ----------------------------
def _silu(v):
    # sigmoid(v) = 0.5*(1 + tanh(0.5*v))  ->  one EUP tanh per element instead of
    # exp + reciprocal (halves EUP pushes; stage A does two full-tensor SiLUs).
    return 0.5 * v * (1.0 + jnp.tanh(0.5 * v))


def _gelu_tanh(v):
    # TODO(synk): nn.GELU() defaults to the exact erf form; the tanh approximation
    # (max abs deviation ~3e-4) is used because tanh has guaranteed Mosaic lowering
    # on all TPU generations.
    c = 0.7978845608028654  # sqrt(2 / pi)
    return 0.5 * v * (1.0 + jnp.tanh(c * (v + 0.044715 * v * v * v)))


# --------------------------------- kernels -----------------------------------
def _stage_a_kernel(x_ref, a_ref, c_ref, w_ref, wb_ref, ls_ref, o_ref, stats_ref,
                    *, tile, hw_valid, need_mask):
    # Blocks: x (1, C, T) f32; a/c (1, C, 1) f32; w (C, C) bf16; wb/ls (C, 1) f32.
    # GroupNorm(1,C)+affine, depthwise-1x1 and eval-mode BN1 folded into (a, c);
    # eval-mode BN2 folded into (w, wb).
    t = pl.program_id(1)
    x = x_ref[0].astype(jnp.float32)                              # (C, T)
    h = _silu(a_ref[0] * x + c_ref[0])                            # norm -> dw conv -> BN -> SiLU
    z = jnp.dot(w_ref[...], h.astype(jnp.bfloat16),               # pw conv on MXU: bf16 in, f32 acc
                preferred_element_type=jnp.float32)
    z = _silu(z + wb_ref[...])                                    # BN2 (folded) -> SiLU
    x1 = x + ls_ref[...] * z                                      # layer_scale_1 * branch + residual
    if need_mask:
        # Zero lanes past the real H*W so padded columns don't pollute the stats.
        lane = jax.lax.broadcasted_iota(jnp.int32, (1, tile), 1) + t * tile
        x1 = jnp.where(lane < hw_valid, x1, 0.0)
    o_ref[0] = x1.astype(o_ref.dtype)

    # Fused GroupNorm-2 partial statistics (sum / sum-of-squares of x1): avoids a
    # full extra HBM read of x1 in the wrapper.  Accumulated across the lane-tile
    # grid axis (marked "arbitrary"); written back when the batch index changes.
    s = jnp.sum(x1)
    q = jnp.sum(x1 * x1)

    @pl.when(t == 0)
    def _():
        stats_ref[...] = jnp.zeros_like(stats_ref)

    row = jax.lax.broadcasted_iota(jnp.int32, (2, 128), 0)
    stats_ref[0] = stats_ref[0] + jnp.where(row == 0, s, q)


def _stage_b_kernel(x_ref, a_ref, c_ref, w1_ref, b1_ref, w2_ref, b2_ref, ls_ref, o_ref,
                    *, hd, hd_chunk):
    # Blocks: x (1, C, T) f32; a/c (1, C, 1) f32; w1 (HD, C) bf16; b1 (HD, 1) f32;
    #         w2 (C, HD) bf16; b2/ls (C, 1) f32.
    x = x_ref[0].astype(jnp.float32)                              # (C, T)
    h = (a_ref[0] * x + c_ref[0]).astype(jnp.bfloat16)            # GroupNorm(1,C) affine, bf16 for MXU
    z = jnp.zeros(x.shape, jnp.float32)
    # Chunk the hidden dimension: bounds the (HD, T) intermediate to (hd_chunk, T),
    # letting a larger lane tile be selected while staying inside VMEM.
    for i0 in range(0, hd, hd_chunk):
        w1c = w1_ref[pl.ds(i0, hd_chunk), :]                      # bf16 (chunk, C)
        g = jnp.dot(w1c, h, preferred_element_type=jnp.float32)   # fc1 chunk (MXU)
        g = _gelu_tanh(g + b1_ref[pl.ds(i0, hd_chunk), :]).astype(jnp.bfloat16)
        z = z + jnp.dot(w2_ref[:, pl.ds(i0, hd_chunk)], g,        # fc2 chunk (MXU), f32 accumulate
                        preferred_element_type=jnp.float32)
    z = z + b2_ref[...]
    o_ref[0] = (x + ls_ref[...] * z).astype(o_ref.dtype)          # layer_scale_2 * branch + residual


# ------------------------------- tiling helpers --------------------------------
def _pick_hd_chunk(hd, target=512):
    """Hidden-dim chunk for stage B (divides hd, capped around 512)."""
    if hd <= target:
        return hd
    for cand in (512, 384, 256, 128, 64):
        if hd % cand == 0:
            return cand
    return hd  # TODO(synk): pad HD to a chunkable size instead of falling back.


def _pick_lane_tile(hw_pad, c, hd_chunk, weight_bytes, budget=_VMEM_BUDGET_BYTES):
    """Largest 128-multiple lane tile dividing hw_pad whose working set (double-
    buffered in/out x blocks + f32/bf16 intermediates + HD-chunked stage-B
    intermediate + double-buffered bf16 weights) stays under `budget`."""
    # Per-lane-column bytes for the worst stage (stage B):
    #   in + out x blocks double-buffered (f32)      : 4 * c * 4
    #   x f32, h bf16, z f32 intermediates           : c * (4 + 2 + 4)
    #   g chunk in f32 and bf16                      : hd_chunk * (4 + 2)
    per_lane = 4 * c * 4 + c * (4 + 2 + 4) + hd_chunk * (4 + 2)
    # Weights are double-buffered by the default pipeline even though their index
    # map is constant.  TODO(synk): mark the weight BlockSpecs pipeline_mode=
    # pl.Buffered(1) to halve this residency once single-buffered constant blocks
    # are exercised in CI.
    fixed = 2 * weight_bytes + (1 << 16)
    avail = budget - fixed
    if avail < 128 * per_lane:
        return 128
    max_t = avail // per_lane
    t = 128
    for cand in (256, 512, 1024, 2048):
        if cand <= max_t and hw_pad % cand == 0:
            t = cand
    return t


# ------------------------------ pallas_call wrappers ---------------------------
def _run_stage_a(x2, a, c, w, wb, ls, *, tile, hw_valid):
    B, C, HWp = x2.shape
    need_mask = HWp != hw_valid
    itemsize = x2.dtype.itemsize
    cost = pl.CostEstimate(
        flops=int(B * HWp * (2 * C * C + 12 * C)),
        transcendentals=int(2 * B * C * HWp),
        bytes_accessed=int(2 * B * C * HWp * itemsize + 2 * C * C),
    )
    kernel = functools.partial(_stage_a_kernel, tile=tile, hw_valid=hw_valid,
                               need_mask=need_mask)
    return pl.pallas_call(
        kernel,
        out_shape=(jax.ShapeDtypeStruct((B, C, HWp), x2.dtype),
                   jax.ShapeDtypeStruct((B, 2, 128), jnp.float32)),
        grid_spec=pltpu.PrefetchScalarGridSpec(
            num_scalar_prefetch=0,
            grid=(B, HWp // tile),
            in_specs=[
                pl.BlockSpec((1, C, tile), lambda b, t: (b, 0, t)),   # x
                pl.BlockSpec((1, C, 1), lambda b, t: (b, 0, 0)),      # per-(b,c) scale (GN1∘dw∘BN1)
                pl.BlockSpec((1, C, 1), lambda b, t: (b, 0, 0)),      # per-(b,c) shift
                pl.BlockSpec((C, C), lambda b, t: (0, 0)),            # pointwise weight (bf16, BN2 folded)
                pl.BlockSpec((C, 1), lambda b, t: (0, 0)),            # pointwise "bias" (BN2 shift)
                pl.BlockSpec((C, 1), lambda b, t: (0, 0)),            # layer_scale_1
            ],
            out_specs=[
                pl.BlockSpec((1, C, tile), lambda b, t: (b, 0, t)),   # x1
                pl.BlockSpec((1, 2, 128), lambda b, t: (b, 0, 0)),    # GN2 partial-stats accumulator
            ],
        ),
        compiler_params=pltpu.CompilerParams(
            dimension_semantics=("parallel", "arbitrary"),   # stats accumulate across lane tiles
            vmem_limit_bytes=_VMEM_LIMIT_BYTES),
        cost_estimate=cost,
    )(x2, a, c, w, wb, ls)


def _run_stage_b(x2, a, c, w1, b1, w2, b2, ls, *, tile, hd_chunk):
    B, C, HWp = x2.shape
    HD = w1.shape[0]
    itemsize = x2.dtype.itemsize
    cost = pl.CostEstimate(
        flops=int(B * HWp * (4 * C * HD + 12 * HD + 4 * C)),
        transcendentals=int(B * HD * HWp),
        bytes_accessed=int(2 * B * C * HWp * itemsize + 4 * C * HD),
    )
    kernel = functools.partial(_stage_b_kernel, hd=HD, hd_chunk=hd_chunk)
    return pl.pallas_call(
        kernel,
        out_shape=jax.ShapeDtypeStruct((B, C, HWp), x2.dtype),
        grid_spec=pltpu.PrefetchScalarGridSpec(
            num_scalar_prefetch=0,
            grid=(B, HWp // tile),
            in_specs=[
                pl.BlockSpec((1, C, tile), lambda b, t: (b, 0, t)),   # x1
                pl.BlockSpec((1, C, 1), lambda b, t: (b, 0, 0)),      # GN2 scale per (b,c)
                pl.BlockSpec((1, C, 1), lambda b, t: (b, 0, 0)),      # GN2 shift per (b,c)
                pl.BlockSpec((HD, C), lambda b, t: (0, 0)),           # fc1 weight (bf16)
                pl.BlockSpec((HD, 1), lambda b, t: (0, 0)),           # fc1 bias
                pl.BlockSpec((C, HD), lambda b, t: (0, 0)),           # fc2 weight (bf16)
                pl.BlockSpec((C, 1), lambda b, t: (0, 0)),            # fc2 bias
                pl.BlockSpec((C, 1), lambda b, t: (0, 0)),            # layer_scale_2
            ],
            out_specs=pl.BlockSpec((1, C, tile), lambda b, t: (b, 0, t)),
        ),
        compiler_params=pltpu.CompilerParams(
            dimension_semantics=("parallel", "parallel"),
            vmem_limit_bytes=_VMEM_LIMIT_BYTES),
        cost_estimate=cost,
    )(x2, a, c, w1, b1, w2, b2, ls)


# ------------------------------ full block forward -----------------------------
def light_mlp_block(x, p, *, gn_eps=1e-5, bn_eps=1e-5):
    """LightMLPBlock forward.  x: [B, C, H, W]; p: parameter dict (see __main__)."""
    B, C, H, W = x.shape
    HW = H * W
    HD = p["fc1_w"].shape[0]
    f32, bf16 = jnp.float32, jnp.bfloat16

    x2 = x.reshape(B, C, HW)

    # GroupNorm(1, C) for branch 1 needs per-sample stats of the *input* before any
    # branch compute, so this one stays a cheap XLA reduction.  (Branch 2's stats
    # are produced inside the stage-A kernel — no extra HBM pass over x1.)
    x32 = x2.astype(f32)
    mu1 = jnp.mean(x32, axis=(1, 2))
    var1 = jnp.mean(jnp.square(x32 - mu1[:, None, None]), axis=(1, 2))
    rstd1 = jax.lax.rsqrt(var1 + gn_eps)

    # Pad H*W up to a 128 multiple: lane-dense tiles, unmasked stores, spatial pipelining.
    HW_pad = ((HW + 127) // 128) * 128
    x2p = jnp.pad(x2, ((0, 0), (0, 0), (0, HW_pad - HW))) if HW_pad != HW else x2

    hd_chunk = _pick_hd_chunk(HD)
    weight_bytes = max(C * C * 2, 2 * C * HD * 2)          # bf16 weights, worst stage
    tile = _pick_lane_tile(HW_pad, C, hd_chunk, weight_bytes)

    # ---- branch 1: norm1 -> DWConv(dw 1x1 -> BN -> SiLU -> pw 1x1 -> BN -> SiLU) ----
    # NOTE: BatchNorm2d is folded in eval mode (running statistics) — standard
    # inference semantics for a forward kernel.
    s_bn1 = p["bn1_gamma"].astype(f32) * jax.lax.rsqrt(p["bn1_var"].astype(f32) + bn_eps)
    t_bn1 = p["bn1_beta"].astype(f32) - p["bn1_mean"].astype(f32) * s_bn1
    k1 = s_bn1 * p["dw_w"].astype(f32)                                        # BN1 ∘ depthwise-1x1
    a1 = (k1 * p["gn1_w"].astype(f32))[None, :] * rstd1[:, None]              # (B, C)
    c1 = (k1 * p["gn1_b"].astype(f32) + t_bn1)[None, :] - a1 * mu1[:, None]   # (B, C)

    s_bn2 = p["bn2_gamma"].astype(f32) * jax.lax.rsqrt(p["bn2_var"].astype(f32) + bn_eps)
    w_pw = (p["pw_w"].astype(f32) * s_bn2[:, None]).astype(bf16)              # BN2 folded, bf16 for MXU
    b_pw = p["bn2_beta"].astype(f32) - p["bn2_mean"].astype(f32) * s_bn2

    x1_p, stats = _run_stage_a(x2p, a1[:, :, None], c1[:, :, None], w_pw, b_pw[:, None],
                               p["ls1"].astype(f32)[:, None], tile=tile, hw_valid=HW)

    # ---- branch 2: norm2 -> Mlp(fc1 1x1 + bias -> GELU -> fc2 1x1 + bias) ----
    # GroupNorm-2 stats from the fused partial sums (single-pass sum / sum-of-squares).
    n_elem = float(C * HW)
    mu2 = stats[:, 0, 0] / n_elem
    var2 = jnp.maximum(stats[:, 1, 0] / n_elem - mu2 * mu2, 0.0)
    rstd2 = jax.lax.rsqrt(var2 + gn_eps)
    a2 = p["gn2_w"].astype(f32)[None, :] * rstd2[:, None]
    c2 = p["gn2_b"].astype(f32)[None, :] - a2 * mu2[:, None]

    out_p = _run_stage_b(x1_p, a2[:, :, None], c2[:, :, None],
                         p["fc1_w"].astype(bf16), p["fc1_b"].astype(f32)[:, None],
                         p["fc2_w"].astype(bf16), p["fc2_b"].astype(f32)[:, None],
                         p["ls2"].astype(f32)[:, None], tile=tile, hd_chunk=hd_chunk)

    out = out_p[:, :, :HW] if HW_pad != HW else out_p
    return out.reshape(B, C, H, W)


# ------------------------------- pure-JAX reference ----------------------------
def _reference_forward(x, p, gn_eps=1e-5, bn_eps=1e-5):
    """Step-by-step f32 port of LightMLPBlock.forward (eval-mode BN, tanh GELU)."""
    hi = jax.lax.Precision.HIGHEST

    def gn(v, g, b):
        mu = jnp.mean(v, axis=(1, 2, 3), keepdims=True)
        var = jnp.mean(jnp.square(v - mu), axis=(1, 2, 3), keepdims=True)
        vhat = (v - mu) * jax.lax.rsqrt(var + gn_eps)
        return vhat * g[None, :, None, None] + b[None, :, None, None]

    def bn(v, gamma, beta, mean, var):
        s = gamma * jax.lax.rsqrt(var + bn_eps)
        return v * s[None, :, None, None] + (beta - mean * s)[None, :, None, None]

    # x = x + ls1 * dw(norm1(x))
    y = gn(x, p["gn1_w"], p["gn1_b"])
    y = y * p["dw_w"][None, :, None, None]                                # depthwise 1x1, no bias
    y = _silu(bn(y, p["bn1_gamma"], p["bn1_beta"], p["bn1_mean"], p["bn1_var"]))
    y = jnp.einsum("oc,bchw->bohw", p["pw_w"], y, precision=hi)           # pointwise 1x1, no bias
    y = _silu(bn(y, p["bn2_gamma"], p["bn2_beta"], p["bn2_mean"], p["bn2_var"]))
    x1 = x + p["ls1"][None, :, None, None] * y

    # x = x + ls2 * mlp(norm2(x))
    y = gn(x1, p["gn2_w"], p["gn2_b"])
    y = jnp.einsum("nc,bchw->bnhw", p["fc1_w"], y, precision=hi) + p["fc1_b"][None, :, None, None]
    y = _gelu_tanh(y)
    y = jnp.einsum("cn,bnhw->bchw", p["fc2_w"], y, precision=hi) + p["fc2_b"][None, :, None, None]
    return x1 + p["ls2"][None, :, None, None] * y


if __name__ == "__main__":
    key = jax.random.PRNGKey(0)
    B, C = 2, 4
    HD = int(C * 4.0)  # mlp_ratio = 4.0

    ks = jax.random.split(key, 24)

    def nrm(i, shape, scale=1.0):
        return scale * jax.random.normal(ks[i], shape, dtype=jnp.float32)

    params = {
        # GroupNorm(1, C) affine params
        "gn1_w": 1.0 + 0.1 * nrm(1, (C,)), "gn1_b": 0.1 * nrm(2, (C,)),
        "gn2_w": 1.0 + 0.1 * nrm(3, (C,)), "gn2_b": 0.1 * nrm(4, (C,)),
        # DWConv: depthwise 1x1 (no bias) + BN + SiLU, then pointwise 1x1 (no bias) + BN + SiLU
        "dw_w": nrm(5, (C,), 0.5),
        "bn1_gamma": 1.0 + 0.1 * nrm(6, (C,)), "bn1_beta": 0.1 * nrm(7, (C,)),
        "bn1_mean": 0.1 * nrm(8, (C,)),
        "bn1_var": 0.5 + jax.random.uniform(ks[9], (C,), dtype=jnp.float32),
        "pw_w": nrm(10, (C, C), 0.3),
        "bn2_gamma": 1.0 + 0.1 * nrm(11, (C,)), "bn2_beta": 0.1 * nrm(12, (C,)),
        "bn2_mean": 0.1 * nrm(13, (C,)),
        "bn2_var": 0.5 + jax.random.uniform(ks[14], (C,), dtype=jnp.float32),
        # Mlp: fc1 (1x1 conv with bias) -> GELU -> fc2 (1x1 conv with bias)
        "fc1_w": nrm(15, (HD, C), 0.2), "fc1_b": 0.1 * nrm(16, (HD,)),
        "fc2_w": nrm(17, (C, HD), 0.2), "fc2_b": 0.1 * nrm(18, (C,)),
        # layer scales (module inits to 1e-5; trained-like values so branches contribute)
        "ls1": 0.2 * nrm(19, (C,)), "ls2": 0.2 * nrm(20, (C,)),
    }

    fwd = jax.jit(light_mlp_block)

    # Case 1: H*W is a 128 multiple.  Case 2: H*W=100 exercises pad + lane-mask path.
    for idx, (H, W) in enumerate(((16, 16), (10, 10))):
        x = jax.random.normal(ks[21 + idx], (B, C, H, W), dtype=jnp.float32)
        y = fwd(x, params)
        jax.block_until_ready(y)
        ref = _reference_forward(x, params)
        err = float(jnp.max(jnp.abs(y - ref)))
        # bf16 MXU operands (weights + activations) vs the f32 reference einsums
        # introduce ~bf16-eps relative error; 2e-2 absolute bounds it comfortably.
        assert err < 2e-2, f"mismatch vs reference at H,W={(H, W)}: max abs err = {err}"

    print("KERNEL_OK")
</pallas_src>

<mosaic_0001>
module attributes {stable_mosaic.version = 11 : i64} {
  func.func @_stage_a_kernel(%arg0: i32, %arg1: i32, %arg2: memref<1x4x256xf32, #tpu.memory_space<vmem>>, %arg3: memref<1x4x1xf32, #tpu.memory_space<vmem>>, %arg4: memref<1x4x1xf32, #tpu.memory_space<vmem>>, %arg5: memref<4x4xbf16, #tpu.memory_space<vmem>>, %arg6: memref<4x1xf32, #tpu.memory_space<vmem>>, %arg7: memref<4x1xf32, #tpu.memory_space<vmem>>, %arg8: memref<1x4x256xf32, #tpu.memory_space<vmem>>, %arg9: memref<1x2x128xf32, #tpu.memory_space<vmem>>) attributes {dimension_semantics = [#tpu.dimension_semantics<parallel>, #tpu.dimension_semantics<arbitrary>], iteration_bounds = array<i64: 2, 1>, scalar_prefetch = 0 : i64, scratch_operands = 0 : i64, tpu.core_type = #tpu.core_type<tc>, window_params = [{transform_indices = @transform_0, window_bounds = array<i64: 1, 4, 256>}, {transform_indices = @transform_1, window_bounds = array<i64: 1, 4, 1>}, {transform_indices = @transform_2, window_bounds = array<i64: 1, 4, 1>}, {pipeline_mode = #tpu.pipeline_mode<synchronous>, transform_indices = @transform_3, window_bounds = array<i64: 4, 4>}, {pipeline_mode = #tpu.pipeline_mode<synchronous>, transform_indices = @transform_4, window_bounds = array<i64: 4, 1>}, {pipeline_mode = #tpu.pipeline_mode<synchronous>, transform_indices = @transform_5, window_bounds = array<i64: 4, 1>}, {transform_indices = @transform_6, window_bounds = array<i64: 1, 4, 256>}, {transform_indices = @transform_7, window_bounds = array<i64: 1, 2, 128>}]} {
    %c0 = arith.constant 0 : index
    %c0_0 = arith.constant 0 : index
    %c0_1 = arith.constant 0 : index
    %0 = vector.load %arg2[%c0, %c0_0, %c0_1] : memref<1x4x256xf32, #tpu.memory_space<vmem>>, vector<1x4x256xf32>
    %1 = vector.shape_cast %0 : vector<1x4x256xf32> to vector<4x256xf32>
    %c0_2 = arith.constant 0 : index
    %c0_3 = arith.constant 0 : index
    %c0_4 = arith.constant 0 : index
    %2 = vector.load %arg3[%c0_2, %c0_3, %c0_4] : memref<1x4x1xf32, #tpu.memory_space<vmem>>, vector<1x4x1xf32>
    %3 = vector.shape_cast %2 : vector<1x4x1xf32> to vector<4x1xf32>
    %4 = vector.broadcast %3 : vector<4x1xf32> to vector<4x256xf32>
    %5 = arith.mulf %4, %1 : vector<4x256xf32>
    %c0_5 = arith.constant 0 : index
    %c0_6 = arith.constant 0 : index
    %c0_7 = arith.constant 0 : index
    %6 = vector.load %arg4[%c0_5, %c0_6, %c0_7] : memref<1x4x1xf32, #tpu.memory_space<vmem>>, vector<1x4x1xf32>
    %7 = vector.shape_cast %6 : vector<1x4x1xf32> to vector<4x1xf32>
    %8 = vector.broadcast %7 : vector<4x1xf32> to vector<4x256xf32>
    %9 = arith.addf %5, %8 : vector<4x256xf32>
    %cst = arith.constant 5.000000e-01 : f32
    %10 = vector.broadcast %cst : f32 to vector<4x256xf32>
    %11 = arith.mulf %10, %9 : vector<4x256xf32>
    %cst_8 = arith.constant 5.000000e-01 : f32
    %12 = vector.broadcast %cst_8 : f32 to vector<4x256xf32>
    %13 = arith.mulf %12, %9 : vector<4x256xf32>
    %14 = math.tanh %13 : vector<4x256xf32>
    %cst_9 = arith.constant 1.000000e+00 : f32
    %15 = vector.broadcast %cst_9 : f32 to vector<4x256xf32>
    %16 = arith.addf %15, %14 : vector<4x256xf32>
    %17 = arith.mulf %11, %16 : vector<4x256xf32>
    %c0_10 = arith.constant 0 : index
    %c0_11 = arith.constant 0 : index
    %18 = vector.load %arg5[%c0_10, %c0_11] : memref<4x4xbf16, #tpu.memory_space<vmem>>, vector<4x4xbf16>
    %19 = arith.truncf %17 : vector<4x256xf32> to vector<4x256xbf16>
    %cst_12 = arith.constant dense<0.000000e+00> : vector<4x256xf32>
    %20 = tpu.matmul %18, %19, %cst_12 {dimension_numbers = #tpu.dot_dimension_numbers<[1], [0], [0], [1], [0, 0, 1, 1], [], []>} : vector<4x4xbf16>, vector<4x256xbf16>, vector<4x256xf32> -> vector<4x256xf32>
    %c0_13 = arith.constant 0 : index
    %c0_14 = arith.constant 0 : index
    %21 = vector.load %arg6[%c0_13, %c0_14] : memref<4x1xf32, #tpu.memory_space<vmem>>, vector<4x1xf32>
    %22 = vector.broadcast %21 : vector<4x1xf32> to vector<4x256xf32>
    %23 = arith.addf %20, %22 : vector<4x256xf32>
    %cst_15 = arith.constant 5.000000e-01 : f32
    %24 = vector.broadcast %cst_15 : f32 to vector<4x256xf32>
    %25 = arith.mulf %24, %23 : vector<4x256xf32>
    %cst_16 = arith.constant 5.000000e-01 : f32
    %26 = vector.broadcast %cst_16 : f32 to vector<4x256xf32>
    %27 = arith.mulf %26, %23 : vector<4x256xf32>
    %28 = math.tanh %27 : vector<4x256xf32>
    %cst_17 = arith.constant 1.000000e+00 : f32
    %29 = vector.broadcast %cst_17 : f32 to vector<4x256xf32>
    %30 = arith.addf %29, %28 : vector<4x256xf32>
    %31 = arith.mulf %25, %30 : vector<4x256xf32>
    %c0_18 = arith.constant 0 : index
    %c0_19 = arith.constant 0 : index
    %32 = vector.load %arg7[%c0_18, %c0_19] : memref<4x1xf32, #tpu.memory_space<vmem>>, vector<4x1xf32>
    %33 = vector.broadcast %32 : vector<4x1xf32> to vector<4x256xf32>
    %34 = arith.mulf %33, %31 : vector<4x256xf32>
    %35 = arith.addf %1, %34 : vector<4x256xf32>
    %c0_20 = arith.constant 0 : index
    %c0_21 = arith.constant 0 : index
    %c0_22 = arith.constant 0 : index
    %36 = vector.load %arg8[%c0_20, %c0_21, %c0_22] : memref<1x4x256xf32, #tpu.memory_space<vmem>>, vector<1x4x256xf32>
    %37 = vector.shape_cast %36 : vector<1x4x256xf32> to vector<4x256xf32>
    %38 = vector.shape_cast %35 : vector<4x256xf32> to vector<1x4x256xf32>
    tpu.vector_store %arg8[%c0_20, %c0_21, %c0_22], %38 {strides = array<i32>} : memref<1x4x256xf32, #tpu.memory_space<vmem>>, vector<1x4x256xf32>,
    %39 = vector.shape_cast %35 : vector<4x256xf32> to vector<1x4x256xf32>
    %cst_23 = arith.constant dense<0.000000e+00> : vector<1xf32>
    %40 = vector.multi_reduction <add>, %39, %cst_23 [1, 2] : vector<1x4x256xf32> to vector<1xf32>
    %41 = vector.shape_cast %40 : vector<1xf32> to vector<1x1x1xf32>
    %42 = vector.extract %41[0, 0, 0] : f32 from vector<1x1x1xf32>
    %43 = arith.mulf %35, %35 : vector<4x256xf32>
    %44 = vector.shape_cast %43 : vector<4x256xf32> to vector<1x4x256xf32>
    %cst_24 = arith.constant dense<0.000000e+00> : vector<1xf32>
    %45 = vector.multi_reduction <add>, %44, %cst_24 [1, 2] : vector<1x4x256xf32> to vector<1xf32>
    %46 = vector.shape_cast %45 : vector<1xf32> to vector<1x1x1xf32>
    %47 = vector.extract %46[0, 0, 0] : f32 from vector<1x1x1xf32>
    %c0_i32 = arith.constant 0 : i32
    %48 = arith.cmpi eq, %arg1, %c0_i32 : i32
    %49 = arith.extui %48 : i1 to i32
    %c0_i32_25 = arith.constant 0 : i32
    %50 = arith.cmpi ne, %49, %c0_i32_25 : i32
    scf.if %50 {
      %cst_33 = arith.constant 0.000000e+00 : f32
      %63 = vector.broadcast %cst_33 : f32 to vector<1x2x128xf32>
      %c0_34 = arith.constant 0 : index
      %c0_35 = arith.constant 0 : index
      %c0_36 = arith.constant 0 : index
      %64 = vector.load %arg9[%c0_34, %c0_35, %c0_36] : memref<1x2x128xf32, #tpu.memory_space<vmem>>, vector<1x2x128xf32>
      tpu.vector_store %arg9[%c0_34, %c0_35, %c0_36], %63 {strides = array<i32>} : memref<1x2x128xf32, #tpu.memory_space<vmem>>, vector<1x2x128xf32>,
    } else {
    }
    %51 = tpu.iota {dimensions = array<i32: 0>} : vector<2x128xi32>
    %c0_26 = arith.constant 0 : index
    %c0_27 = arith.constant 0 : index
    %c0_28 = arith.constant 0 : index
    %52 = vector.load %arg9[%c0_26, %c0_27, %c0_28] : memref<1x2x128xf32, #tpu.memory_space<vmem>>, vector<1x2x128xf32>
    %53 = vector.shape_cast %52 : vector<1x2x128xf32> to vector<2x128xf32>
    %c0_i32_29 = arith.constant 0 : i32
    %54 = vector.broadcast %c0_i32_29 : i32 to vector<2x128xi32>
    %55 = arith.cmpi eq, %51, %54 : vector<2x128xi32>
    %56 = vector.broadcast %42 : f32 to vector<2x128xf32>
    %57 = vector.broadcast %47 : f32 to vector<2x128xf32>
    %58 = arith.select %55, %56, %57 : vector<2x128xi1>, vector<2x128xf32>
    %59 = arith.addf %53, %58 : vector<2x128xf32>
    %c0_30 = arith.constant 0 : index
    %c0_31 = arith.constant 0 : index
    %c0_32 = arith.constant 0 : index
    %60 = vector.load %arg9[%c0_30, %c0_31, %c0_32] : memref<1x2x128xf32, #tpu.memory_space<vmem>>, vector<1x2x128xf32>
    %61 = vector.shape_cast %60 : vector<1x2x128xf32> to vector<2x128xf32>
    %62 = vector.shape_cast %59 : vector<2x128xf32> to vector<1x2x128xf32>
    tpu.vector_store %arg9[%c0_30, %c0_31, %c0_32], %62 {strides = array<i32>} : memref<1x2x128xf32, #tpu.memory_space<vmem>>, vector<1x2x128xf32>,
    return
  }
  func.func @transform_0(%arg0: i32, %arg1: i32) -> (i32, i32, i32) {
    %c0_i32 = arith.constant 0 : i32
    %c0_i32_0 = arith.constant 0 : i32
    return %arg0, %c0_i32, %arg1 : i32, i32, i32
  }
  func.func @transform_1(%arg0: i32, %arg1: i32) -> (i32, i32, i32) {
    %c0_i32 = arith.constant 0 : i32
    %c0_i32_0 = arith.constant 0 : i32
    %c0_i32_1 = arith.constant 0 : i32
    return %arg0, %c0_i32, %c0_i32_0 : i32, i32, i32
  }
  func.func @transform_2(%arg0: i32, %arg1: i32) -> (i32, i32, i32) {
    %c0_i32 = arith.constant 0 : i32
    %c0_i32_0 = arith.constant 0 : i32
    %c0_i32_1 = arith.constant 0 : i32
    return %arg0, %c0_i32, %c0_i32_0 : i32, i32, i32
  }
  func.func @transform_3(%arg0: i32, %arg1: i32) -> (i32, i32) {
    %c0_i32 = arith.constant 0 : i32
    %c0_i32_0 = arith.constant 0 : i32
    %c0_i32_1 = arith.constant 0 : i32
    return %c0_i32, %c0_i32_0 : i32, i32
  }
  func.func @transform_4(%arg0: i32, %arg1: i32) -> (i32, i32) {
    %c0_i32 = arith.constant 0 : i32
    %c0_i32_0 = arith.constant 0 : i32
    %c0_i32_1 = arith.constant 0 : i32
    return %c0_i32, %c0_i32_0 : i32, i32
  }
  func.func @transform_5(%arg0: i32, %arg1: i32) -> (i32, i32) {
    %c0_i32 = arith.constant 0 : i32
    %c0_i32_0 = arith.constant 0 : i32
    %c0_i32_1 = arith.constant 0 : i32
    return %c0_i32, %c0_i32_0 : i32, i32
  }
  func.func @transform_6(%arg0: i32, %arg1: i32) -> (i32, i32, i32) {
    %c0_i32 = arith.constant 0 : i32
    %c0_i32_0 = arith.constant 0 : i32
    return %arg0, %c0_i32, %arg1 : i32, i32, i32
  }
  func.func @transform_7(%arg0: i32, %arg1: i32) -> (i32, i32, i32) {
    %c0_i32 = arith.constant 0 : i32
    %c0_i32_0 = arith.constant 0 : i32
    %c0_i32_1 = arith.constant 0 : i32
    return %arg0, %c0_i32, %c0_i32_0 : i32, i32, i32
  }
}

module attributes {stable_mosaic.version = 11 : i64} {
  func.func @_stage_b_kernel(%arg0: i32, %arg1: i32, %arg2: memref<1x4x256xf32, #tpu.memory_space<vmem>>, %arg3: memref<1x4x1xf32, #tpu.memory_space<vmem>>, %arg4: memref<1x4x1xf32, #tpu.memory_space<vmem>>, %arg5: memref<16x4xbf16, #tpu.memory_space<vmem>>, %arg6: memref<16x1xf32, #tpu.memory_space<vmem>>, %arg7: memref<4x16xbf16, #tpu.memory_space<vmem>>, %arg8: memref<4x1xf32, #tpu.memory_space<vmem>>, %arg9: memref<4x1xf32, #tpu.memory_space<vmem>>, %arg10: memref<1x4x256xf32, #tpu.memory_space<vmem>>) attributes {dimension_semantics = [#tpu.dimension_semantics<parallel>, #tpu.dimension_semantics<parallel>], iteration_bounds = array<i64: 2, 1>, scalar_prefetch = 0 : i64, scratch_operands = 0 : i64, tpu.core_type = #tpu.core_type<tc>, window_params = [{transform_indices = @transform_0, window_bounds = array<i64: 1, 4, 256>}, {transform_indices = @transform_1, window_bounds = array<i64: 1, 4, 1>}, {transform_indices = @transform_2, window_bounds = array<i64: 1, 4, 1>}, {pipeline_mode = #tpu.pipeline_mode<synchronous>, transform_indices = @transform_3, window_bounds = array<i64: 16, 4>}, {pipeline_mode = #tpu.pipeline_mode<synchronous>, transform_indices = @transform_4, window_bounds = array<i64: 16, 1>}, {pipeline_mode = #tpu.pipeline_mode<synchronous>, transform_indices = @transform_5, window_bounds = array<i64: 4, 16>}, {pipeline_mode = #tpu.pipeline_mode<synchronous>, transform_indices = @transform_6, window_bounds = array<i64: 4, 1>}, {pipeline_mode = #tpu.pipeline_mode<synchronous>, transform_indices = @transform_7, window_bounds = array<i64: 4, 1>}, {transform_indices = @transform_8, window_bounds = array<i64: 1, 4, 256>}]} {
    %c0 = arith.constant 0 : index
    %c0_0 = arith.constant 0 : index
    %c0_1 = arith.constant 0 : index
    %0 = vector.load %arg2[%c0, %c0_0, %c0_1] : memref<1x4x256xf32, #tpu.memory_space<vmem>>, vector<1x4x256xf32>
    %1 = vector.shape_cast %0 : vector<1x4x256xf32> to vector<4x256xf32>
    %c0_2 = arith.constant 0 : index
    %c0_3 = arith.constant 0 : index
    %c0_4 = arith.constant 0 : index
    %2 = vector.load %arg3[%c0_2, %c0_3, %c0_4] : memref<1x4x1xf32, #tpu.memory_space<vmem>>, vector<1x4x1xf32>
    %3 = vector.shape_cast %2 : vector<1x4x1xf32> to vector<4x1xf32>
    %4 = vector.broadcast %3 : vector<4x1xf32> to vector<4x256xf32>
    %5 = arith.mulf %4, %1 : vector<4x256xf32>
    %c0_5 = arith.constant 0 : index
    %c0_6 = arith.constant 0 : index
    %c0_7 = arith.constant 0 : index
    %6 = vector.load %arg4[%c0_5, %c0_6, %c0_7] : memref<1x4x1xf32, #tpu.memory_space<vmem>>, vector<1x4x1xf32>
    %7 = vector.shape_cast %6 : vector<1x4x1xf32> to vector<4x1xf32>
    %8 = vector.broadcast %7 : vector<4x1xf32> to vector<4x256xf32>
    %9 = arith.addf %5, %8 : vector<4x256xf32>
    %10 = arith.truncf %9 : vector<4x256xf32> to vector<4x256xbf16>
    %cst = arith.constant 0.000000e+00 : f32
    %11 = vector.broadcast %cst : f32 to vector<4x256xf32>
    %c0_8 = arith.constant 0 : index
    %c0_9 = arith.constant 0 : index
    %12 = vector.load %arg5[%c0_8, %c0_9] : memref<16x4xbf16, #tpu.memory_space<vmem>>, vector<16x4xbf16>
    %cst_10 = arith.constant dense<0.000000e+00> : vector<16x256xf32>
    %13 = tpu.matmul %12, %10, %cst_10 {dimension_numbers = #tpu.dot_dimension_numbers<[1], [0], [0], [1], [0, 0, 1, 1], [], []>} : vector<16x4xbf16>, vector<4x256xbf16>, vector<16x256xf32> -> vector<16x256xf32>
    %c0_11 = arith.constant 0 : index
    %c0_12 = arith.constant 0 : index
    %14 = vector.load %arg6[%c0_11, %c0_12] : memref<16x1xf32, #tpu.memory_space<vmem>>, vector<16x1xf32>
    %15 = vector.broadcast %14 : vector<16x1xf32> to vector<16x256xf32>
    %16 = arith.addf %13, %15 : vector<16x256xf32>
    %cst_13 = arith.constant 5.000000e-01 : f32
    %17 = vector.broadcast %cst_13 : f32 to vector<16x256xf32>
    %18 = arith.mulf %17, %16 : vector<16x256xf32>
    %cst_14 = arith.constant 4.471500e-02 : f32
    %19 = vector.broadcast %cst_14 : f32 to vector<16x256xf32>
    %20 = arith.mulf %19, %16 : vector<16x256xf32>
    %21 = arith.mulf %20, %16 : vector<16x256xf32>
    %22 = arith.mulf %21, %16 : vector<16x256xf32>
    %23 = arith.addf %16, %22 : vector<16x256xf32>
    %cst_15 = arith.constant 0.797884583 : f32
    %24 = vector.broadcast %cst_15 : f32 to vector<16x256xf32>
    %25 = arith.mulf %24, %23 : vector<16x256xf32>
    %26 = math.tanh %25 : vector<16x256xf32>
    %cst_16 = arith.constant 1.000000e+00 : f32
    %27 = vector.broadcast %cst_16 : f32 to vector<16x256xf32>
    %28 = arith.addf %27, %26 : vector<16x256xf32>
    %29 = arith.mulf %18, %28 : vector<16x256xf32>
    %30 = arith.truncf %29 : vector<16x256xf32> to vector<16x256xbf16>
    %c0_17 = arith.constant 0 : index
    %c0_18 = arith.constant 0 : index
    %31 = vector.load %arg7[%c0_17, %c0_18] : memref<4x16xbf16, #tpu.memory_space<vmem>>, vector<4x16xbf16>
    %cst_19 = arith.constant dense<0.000000e+00> : vector<4x256xf32>
    %32 = tpu.matmul %31, %30, %cst_19 {dimension_numbers = #tpu.dot_dimension_numbers<[1], [0], [0], [1], [0, 0, 1, 1], [], []>} : vector<4x16xbf16>, vector<16x256xbf16>, vector<4x256xf32> -> vector<4x256xf32>
    %33 = arith.addf %11, %32 : vector<4x256xf32>
    %c0_20 = arith.constant 0 : index
    %c0_21 = arith.constant 0 : index
    %34 = vector.load %arg8[%c0_20, %c0_21] : memref<4x1xf32, #tpu.memory_space<vmem>>, vector<4x1xf32>
    %35 = vector.broadcast %34 : vector<4x1xf32> to vector<4x256xf32>
    %36 = arith.addf %33, %35 : vector<4x256xf32>
    %c0_22 = arith.constant 0 : index
    %c0_23 = arith.constant 0 : index
    %37 = vector.load %arg9[%c0_22, %c0_23] : memref<4x1xf32, #tpu.memory_space<vmem>>, vector<4x1xf32>
    %38 = vector.broadcast %37 : vector<4x1xf32> to vector<4x256xf32>
    %39 = arith.mulf %38, %36 : vector<4x256xf32>
    %40 = arith.addf %1, %39 : vector<4x256xf32>
    %c0_24 = arith.constant 0 : index
    %c0_25 = arith.constant 0 : index
    %c0_26 = arith.constant 0 : index
    %41 = vector.load %arg10[%c0_24, %c0_25, %c0_26] : memref<1x4x256xf32, #tpu.memory_space<vmem>>, vector<1x4x256xf32>
    %42 = vector.shape_cast %41 : vector<1x4x256xf32> to vector<4x256xf32>
    %43 = vector.shape_cast %40 : vector<4x256xf32> to vector<1x4x256xf32>
    tpu.vector_store %arg10[%c0_24, %c0_25, %c0_26], %43 {strides = array<i32>} : memref<1x4x256xf32, #tpu.memory_space<vmem>>, vector<1x4x256xf32>,
    return
  }
  func.func @transform_0(%arg0: i32, %arg1: i32) -> (i32, i32, i32) {
    %c0_i32 = arith.constant 0 : i32
    %c0_i32_0 = arith.constant 0 : i32
    return %arg0, %c0_i32, %arg1 : i32, i32, i32
  }
  func.func @transform_1(%arg0: i32, %arg1: i32) -> (i32, i32, i32) {
    %c0_i32 = arith.constant 0 : i32
    %c0_i32_0 = arith.constant 0 : i32
    %c0_i32_1 = arith.constant 0 : i32
    return %arg0, %c0_i32, %c0_i32_0 : i32, i32, i32
  }
  func.func @transform_2(%arg0: i32, %arg1: i32) -> (i32, i32, i32) {
    %c0_i32 = arith.constant 0 : i32
    %c0_i32_0 = arith.constant 0 : i32
    %c0_i32_1 = arith.constant 0 : i32
    return %arg0, %c0_i32, %c0_i32_0 : i32, i32, i32
  }
  func.func @transform_3(%arg0: i32, %arg1: i32) -> (i32, i32) {
    %c0_i32 = arith.constant 0 : i32
    %c0_i32_0 = arith.constant 0 : i32
    %c0_i32_1 = arith.constant 0 : i32
    return %c0_i32, %c0_i32_0 : i32, i32
  }
  func.func @transform_4(%arg0: i32, %arg1: i32) -> (i32, i32) {
    %c0_i32 = arith.constant 0 : i32
    %c0_i32_0 = arith.constant 0 : i32
    %c0_i32_1 = arith.constant 0 : i32
    return %c0_i32, %c0_i32_0 : i32, i32
  }
  func.func @transform_5(%arg0: i32, %arg1: i32) -> (i32, i32) {
    %c0_i32 = arith.constant 0 : i32
    %c0_i32_0 = arith.constant 0 : i32
    %c0_i32_1 = arith.constant 0 : i32
    return %c0_i32, %c0_i32_0 : i32, i32
  }
  func.func @transform_6(%arg0: i32, %arg1: i32) -> (i32, i32) {
    %c0_i32 = arith.constant 0 : i32
    %c0_i32_0 = arith.constant 0 : i32
    %c0_i32_1 = arith.constant 0 : i32
    return %c0_i32, %c0_i32_0 : i32, i32
  }
  func.func @transform_7(%arg0: i32, %arg1: i32) -> (i32, i32) {
    %c0_i32 = arith.constant 0 : i32
    %c0_i32_0 = arith.constant 0 : i32
    %c0_i32_1 = arith.constant 0 : i32
    return %c0_i32, %c0_i32_0 : i32, i32
  }
  func.func @transform_8(%arg0: i32, %arg1: i32) -> (i32, i32, i32) {
    %c0_i32 = arith.constant 0 : i32
    %c0_i32_0 = arith.constant 0 : i32
    return %arg0, %c0_i32, %arg1 : i32, i32, i32
  }
}

</mosaic_0001>

<bundles_post_ra>
// kernel: light_mlp_block.2
= control target key start
LH: loop header
LB: loop body
LE: loop exit
PB: predicated region body
PF: predicated region fallthrough
CT: control target
= control target key end

     0   :  { %s1711_s0 = inlined_call_operand.hbm [shape: f32[2,4,256], index: 0, kind: input, shape index: {}]   ;;  %s1712_s1 = inlined_call_operand.hbm [shape: f32[2,4,1], index: 1, kind: input, shape index: {}]   ;;  %s1713_s2 = inlined_call_operand.hbm [shape: f32[2,4,1], index: 2, kind: input, shape index: {}]   ;;  %s1714_s3 = inlined_call_operand.hbm [shape: bf16[4,4], index: 3, kind: input, shape index: {}]   ;;  %s1715_s4 = inlined_call_operand.hbm [shape: f32[4,1], index: 4, kind: input, shape index: {}]   ;;  %s1716_s5 = inlined_call_operand.hbm [shape: f32[4,1], index: 5, kind: input, shape index: {}]   ;;  %s1717_s6 = inlined_call_operand.hbm [shape: f32[2,4,256], index: 6, kind: output, shape index: {0}]   ;;  %s1718_s7 = inlined_call_operand.hbm [shape: f32[2,2,128], index: 7, kind: output, shape index: {1}]  }
   0x1   :  { %1741 = sst [smem:[#allocation29_spill]] %s1712_s1 }
   0x2   :  { %1742 = sst [smem:[#allocation30_spill]] %s1714_s3 }
   0x3   :  { %1743 = sst [smem:[#allocation31_spill]] %s1717_s6 }
   0x4   :  { %1744 = sst [smem:[#allocation32_spill]] %s1718_s7 }
   0x5   :  { %13 = vsyncpa [#allocation3], 0 }
   0x6   :  { %15 = vsyncpa [#allocation3 + $0x1], 0 }
   0x7   :  { %16 = vsyncpa [#allocation6], 0 }
   0x8   :  { %18 = vsyncpa [#allocation6 + $0x1], 0 }
   0x9   :  { %19 = vsyncpa [#allocation9], 0 }
   0xa   :  { %20 = vsyncpa [#allocation12], 0 }
   0xb   :  { %21 = vsyncpa [#allocation4], 0 }
   0xc   :  { %23 = vsyncpa [#allocation4 + $0x1], 0 }
   0xd   :  { %24 = vsyncpa [#allocation15], 0 }
   0xe   :  { %26 = vsyncpa [#allocation15 + $0x1], 0  ;;  %s1327_s24 = smov 0   ;;  %s1329_s25 = smov 0  }
   0xf   :  { %s1331_s26 = smov 0   ;;  %s1333_s27 = smov 0  }
  0x10   :  { %s1335_s28 = smov 0   ;;  %s1337_s29 = smov 0  }
  0x11 LB: > { %1745 = sst [smem:[#allocation22_spill]] %s1255_s24  ;;  %s1358_s30 = sadd.s32 4294967295, %s1275_s29   ;;  %s1275_s29 = sphi %s1337_s29, %s32_s29   ;;  %s1271_s28 = sphi %s1335_s28, %s1792_s28   ;;  %s1267_s27 = sphi %s1333_s27, %s1791_s27   ;;  %s1263_s26 = sphi %s1331_s26, %s1787_s26   ;;  %s1259_s25 = sphi %s1329_s25, %s1790_s25   ;;  %s1255_s24 = sphi %s1327_s24, %s1789_s24  }
  0x12   : > { %1746 = sst [smem:[#allocation23_spill]] %s1263_s26  ;;  %s817_s8 = sadd.s32 4294967294, %s1275_s29  }
  0x13   : > { %1747 = sst [smem:[#allocation24_spill]] %s1275_s29  ;;  %p66_p0 = scmp.ne.s32.totalorder %s1259_s25, %s1255_s24 }
  0x14   : > { %p1719_p1 = scmp.eq.s32.totalorder %s1358_s30, 0  ;;  %p213_p3 = scmp.eq.s32.totalorder %s817_s8, 1 }
  0x15   : > { %p818_p5 = scmp.ge.s32.totalorder %s1275_s29, 1  ;;  %p246_p7 = scmp.lt.s32.totalorder %s1275_s29, 3 }
  0x16   : > { %p1367_p4 = por %p1719_p1, %p66_p0  ;;  %p1372_p6 = por %p213_p3, %p66_p0 }
  0x17   : > { %p1377_p8 = pnand %p818_p5, %p246_p7  ;;  %s1277_s12 = smov [#allocation8]  }
  0x18   : > { %s1748_s9 = scalar_select %p1367_p4, 1, 0 }
  0x19   : > { %s1749_s10 = scalar_select %p1372_p6, 1, 0 }
  0x1a   : > { %s1751_s11 = scalar_select %p1377_p8, 1, 0 }
  0x1b   : > { %1750 = sst [smem:[#allocation25_spill]] %s1749_s10  ;;  %s259_s13 = sshll.u32 %s1277_s12, 4  ;;  %s260_s13 = int_to_ptr.vmem [resolvable:$true] %s259_s13 }
  0x1c   : > { %p876_p10 = pneg %p1377_p8  ;;  %s44_s15 = sadd.s32 1, %s1271_s28 }
  0x1d   : > { %s53_s16 = sadd.s32 1, %s1263_s26  ;;  %p1392_p12 = scmp.ge.s32.totalorder %s44_s15, 2 }
  0x1e   : > { %p1386_p11 = pnand %p876_p10, %p1719_p1  ;;  %s1754_s3 = sld [smem:[#allocation30_spill]] }
  0x1f   : > { %s1753_s17 = scalar_select %p1392_p12, 1, 0 }
  0x20   : > { %s1752_s14 = scalar_select %p1386_p11, 1, 0 }
  0x21   : > { %p1404_p0 = pneg %p1386_p11 }
  0x23   : > { %s1755_s23 = scalar_select %p1404_p0, 1, 0 }
  0x24   : > { %s975_s20 = scalar_lea.hbm %s1754_s3, 32 }
  0x25   : > { %p976_p13 = scmp.ne.s32.totalorder %s1754_s3, %s975_s20  ;;  %p982_p7 = scmp.lt.u32.totalorder %s975_s20, %s1754_s3 }
  0x27   : > { %p978_p3 = pnand %p1404_p0, %p976_p13 }
  0x29   : > { %p979_p5 = pneg %p978_p3 }
  0x2b   : > { %p984_p10 = pnand %p982_p7, %p979_p5 }
  0x2d   : > { %987 = shalt.err (!%p984_p10)
}
  0x2e   : > { %s988_s18 = scalar_lea.vmem %s260_s13, 32  ;;  %p996_p6 = scmp.lt.s32.totalorder %s260_s13, %s260_s13 }
  0x2f   : > { %p989_p9 = scmp.ne.s32.totalorder %s260_s13, %s988_s18  ;;  %p997_p4 = scmp.lt.s32.totalorder %s988_s18, %s988_s18 }
  0x31   : > { %p991_p1 = pnand %p989_p9, %p1404_p0  ;;  %p998_p8 = por %p997_p4, %p996_p6 }
  0x33   : > { %p992_p2 = pneg %p991_p1 }
  0x35   : > { %p999_p12 = pnand %p998_p8, %p992_p2 }
  0x37   : > { %1002 = shalt.err (!%p999_p12)
}
  0x38   : > { %879 = dma.hbm_to_vmem [thread:$0]  (!%p1386_p11), %s1754_s3, 32, %s260_s13, [#allocation9]  }
  0x39   : > { %p1756_p1 = scmp.ne.s32.totalorder %s1753_s17, 0  ;;  %p60_p2 = scmp.ne.s32.totalorder %s1263_s26, %s1259_s25 }
  0x3a   : > { %p61_p4 = scmp.eq.s32.totalorder %s1275_s29, 0  ;;  %p906_p6 = scmp.lt.s32.totalorder %s1275_s29, 2 }
  0x3b   : > { %s1794_s15 = smov (%p1756_p1, %s44_s15), 0  ;;  %p1758_p12 = scmp.eq.s32.totalorder %s1358_s30, 1 }
  0x3c   : > { %1757 = sst [smem:[#allocation26_spill]] %s1794_s15  ;;  %s48_s20 = ssub.s32 %s1271_s28, %s1794_s15 }
  0x3d   : > { %p51_p8 = scmp.eq.s32.totalorder %s48_s20, 0  ;;  %p62_p9 = por %p61_p4, %p60_p2 }
  0x3e   : > { %p1432_p13 = por %p1758_p12, %p60_p2  ;;  %s1437_s8 = sand.u32 1, %s1263_s26  }
  0x3f   : > { %s1442_s13 = scalar_select %p51_p8, %s1263_s26, %s53_s16  }
  0x40   : > { %s1759_s22 = scalar_select %p1432_p13, 1, 0 }
  0x41   : > { %1761 = sst [smem:[#allocation28_spill]] %s1442_s13  ;;  %p1444_p3 = pnand %p906_p6, %p62_p9 }
  0x42   : > { %1760 = sst [smem:[#allocation27_spill]] %s1759_s22  ;;  %s313_s12 = sand.u32 1, %s1275_s29  }
  0x43   : > { %s1762_s17 = scalar_select %p1444_p3, 1, 0 }
  0x44   : > { %s1724_s18 = sshll.u32 %s1437_s8, 2  ;;  %s1725_s19 = sshll.u32 %s1271_s28, 6 }
  0x45   : > { %s317_s21 = scalar_lea.vmem [#allocation5], %s1724_s18  ;;  %s1763_s1 = sld [smem:[#allocation29_spill]] }
  0x46   : > { %s324_s20 = sshll.u32 %s317_s21, 4  ;;  %s1462_s16 = scalar_lea.sflag [#allocation6], %s313_s12  ;;  %s1460_s20 = int_to_ptr.vmem [resolvable:$true] %s324_s20 }
  0x47   : > { %p1468_p7 = pneg %p1444_p3 }
  0x4b   : > { %s1458_s10 = scalar_lea.hbm %s1763_s1, %s1725_s19  ;;  %s1008_s21 = scalar_lea.hbm %s1763_s1, 128 }
  0x4c   : > { %s1003_s13 = scalar_lea.hbm %s1458_s10, 64  ;;  %p1009_p2 = scmp.lt.u32.totalorder %s1458_s10, %s1763_s1 }
  0x4d   : > { %p1004_p5 = scmp.ne.s32.totalorder %s1458_s10, %s1003_s13  ;;  %p1010_p4 = scmp.lt.u32.totalorder %s1008_s21, %s1003_s13 }
  0x4e   : > { %p1012_p8 = scmp.lt.u32.totalorder %s1003_s13, %s1458_s10 }
  0x4f   : > { %p1006_p10 = pnand %p1468_p7, %p1004_p5  ;;  %p1011_p6 = por %p1010_p4, %p1009_p2 }
  0x51   : > { %p1007_p1 = pneg %p1006_p10  ;;  %p1013_p9 = por %p1012_p8, %p1011_p6 }
  0x53   : > { %p1014_p12 = pnand %p1013_p9, %p1007_p1 }
  0x55   : > { %1017 = shalt.err (!%p1014_p12)
}
  0x56   : > { %s1018_s12 = scalar_lea.vmem %s1460_s20, 64  ;;  %s1278_s3 = smov [#allocation5]  }
  0x57   : > { %p1019_p5 = scmp.ne.s32.totalorder %s1460_s20, %s1018_s12  ;;  %s1023_s15 = sshll.u32 %s1278_s3, 4  ;;  %s1024_s15 = int_to_ptr.vmem [resolvable:$false] %s1023_s15 }
  0x58   : > { %s1025_s26 = scalar_lea.vmem %s1024_s15, 128  ;;  %p1026_p11 = scmp.lt.s32.totalorder %s1460_s20, %s1024_s15 }
  0x59   : > { %p1021_p10 = pnand %p1019_p5, %p1468_p7  ;;  %p1027_p0 = scmp.lt.s32.totalorder %s1025_s26, %s1018_s12 }
  0x5b   : > { %p1022_p13 = pneg %p1021_p10  ;;  %p1028_p2 = por %p1027_p0, %p1026_p11 }
  0x5d   : > { %p1029_p4 = pnand %p1028_p2, %p1022_p13 }
  0x5f   : > { %1032 = shalt.err (!%p1029_p4)
}
  0x60   : > { %892 = dma.hbm_to_vmem [thread:$0]  (!%p1444_p3), %s1458_s10, 64, %s1460_s20, %s1462_s16  }
  0x61   : > { %s1765_s13 = sshll.u32 %s1271_s28, 6  ;;  %s1279_s1 = smov [#allocation10]  }
  0x62   : > { %s1497_s3 = scalar_lea.hbm %s1713_s2, %s1765_s13  ;;  %s270_s15 = sshll.u32 %s1279_s1, 4  ;;  %s271_s15 = int_to_ptr.vmem [resolvable:$true] %s270_s15 }
  0x63   : > { %s1280_s12 = smov [#allocation11]   ;;  %s1033_s7 = scalar_lea.hbm %s1715_s4, 64 }
  0x64   : > { %s281_s26 = sshll.u32 %s1280_s12, 4  ;;  %p1034_p11 = scmp.ne.s32.totalorder %s1715_s4, %s1033_s7  ;;  %s1499_s26 = int_to_ptr.vmem [resolvable:$true] %s281_s26 }
  0x65   : > { %p1766_p0 = scmp.ne.s32.totalorder %s1755_s23, 0  ;;  %p1040_p6 = scmp.lt.u32.totalorder %s1033_s7, %s1715_s4 }
  0x67   : > { %p1036_p13 = pnand %p1034_p11, %p1766_p0 }
  0x69   : > { %p1037_p1 = pneg %p1036_p13 }
  0x6b   : > { %p1042_p8 = pnand %p1040_p6, %p1037_p1 }
  0x6d   : > { %1045 = shalt.err (!%p1042_p8)
}
  0x6e   : > { %s1046_s1 = scalar_lea.vmem %s271_s15, 64  ;;  %p1054_p10 = scmp.lt.s32.totalorder %s271_s15, %s271_s15 }
  0x6f   : > { %p1047_p9 = scmp.ne.s32.totalorder %s271_s15, %s1046_s1  ;;  %p1055_p2 = scmp.lt.s32.totalorder %s1046_s1, %s1046_s1 }
  0x71   : > { %p1049_p12 = pnand %p1047_p9, %p1766_p0  ;;  %p1056_p4 = por %p1055_p2, %p1054_p10 }
  0x73   : > { %p1050_p5 = pneg %p1049_p12 }
  0x75   : > { %p1057_p3 = pnand %p1056_p4, %p1050_p5 }
  0x77   : > { %1060 = shalt.err (!%p1057_p3)
}
  0x78   : > { %p1767_p11 = scmp.ne.s32.totalorder %s1752_s14, 0  ;;  %s1061_s22 = scalar_lea.hbm %s1716_s5, 64 }
  0x79   : > { %p1062_p13 = scmp.ne.s32.totalorder %s1716_s5, %s1061_s22  ;;  %p1068_p3 = scmp.lt.u32.totalorder %s1061_s22, %s1716_s5 }
  0x7a   : > { %882 = dma.hbm_to_vmem [thread:$0]  (!%p1767_p11), %s1715_s4, 64, %s271_s15, [#allocation9]  }
  0x7b   : > { %p1064_p1 = pnand %p1062_p13, %p1766_p0 }
  0x7d   : > { %p1065_p6 = pneg %p1064_p1 }
  0x7f   : > { %p1070_p8 = pnand %p1068_p3, %p1065_p6 }
  0x81   : > { %1073 = shalt.err (!%p1070_p8)
}
  0x82   : > { %s1074_s15 = scalar_lea.vmem %s1499_s26, 64  ;;  %p1082_p10 = scmp.lt.s32.totalorder %s1499_s26, %s1499_s26 }
  0x83   : > { %p1075_p9 = scmp.ne.s32.totalorder %s1499_s26, %s1074_s15  ;;  %p1083_p2 = scmp.lt.s32.totalorder %s1074_s15, %s1074_s15 }
  0x85   : > { %p1077_p12 = pnand %p1075_p9, %p1766_p0  ;;  %p1084_p4 = por %p1083_p2, %p1082_p10 }
  0x87   : > { %p1078_p5 = pneg %p1077_p12 }
  0x89   : > { %p1085_p13 = pnand %p1084_p4, %p1078_p5 }
  0x8b   : > { %1088 = shalt.err (!%p1085_p13)
}
  0x8c   : > { %885 = dma.hbm_to_vmem [thread:$0]  (!%p1767_p11), %s1716_s5, 64, %s1499_s26, [#allocation12]  }
  0x8d   : > { %s823_s23 = sshll.u32 %s1437_s8, 3  ;;  %s848_s1 = sshll.u32 %s1271_s28, 7 }
  0x8e   : > { %s1547_s7 = scalar_lea.hbm %s1711_s0, %s848_s1  ;;  %s296_s14 = scalar_lea.vmem [#allocation2], %s823_s23 }
  0x8f   : > { %s306_s29 = sshll.u32 %s296_s14, 4  ;;  %s1768_s22 = sshll.u32 %s1437_s8, 2  ;;  %s1549_s29 = int_to_ptr.vmem [resolvable:$true] %s306_s29 }
  0x90   : > { %s1553_s13 = scalar_lea.vmem [#allocation7], %s1768_s22  ;;  %s293_s19 = scalar_lea.sflag [#allocation3], %s1437_s8 }
  0x91   : > { %s342_s26 = sshll.u32 %s1553_s13, 4  ;;  %s1089_s21 = scalar_lea.hbm %s1547_s7, 128  ;;  %s343_s26 = int_to_ptr.vmem [resolvable:$true] %s342_s26 }
  0x92   : > { %p1090_p0 = scmp.ne.s32.totalorder %s1547_s7, %s1089_s21  ;;  %s1094_s10 = scalar_lea.hbm %s1711_s0, 256 }
  0x93   : > { %p1095_p6 = scmp.lt.u32.totalorder %s1547_s7, %s1711_s0  ;;  %p1096_p3 = scmp.lt.u32.totalorder %s1094_s10, %s1089_s21 }
  0x94   : > { %p1092_p11 = pnand %p1090_p0, %p1468_p7  ;;  %p1098_p9 = scmp.lt.u32.totalorder %s1089_s21, %s1547_s7 }
  0x95   : > { %p1097_p8 = por %p1096_p3, %p1095_p6 }
  0x96   : > { %p1093_p1 = pneg %p1092_p11 }
  0x97   : > { %p1099_p12 = por %p1098_p9, %p1097_p8 }
  0x99   : > { %p1100_p5 = pnand %p1099_p12, %p1093_p1 }
  0x9b   : > { %1103 = shalt.err (!%p1100_p5)
}
  0x9c   : > { %s1104_s8 = scalar_lea.vmem %s1549_s29, 128  ;;  %s1281_s1 = smov [#allocation2]  }
  0x9d   : > { %p1105_p10 = scmp.ne.s32.totalorder %s1549_s29, %s1104_s8  ;;  %s1109_s6 = sshll.u32 %s1281_s1, 4  ;;  %s1110_s6 = int_to_ptr.vmem [resolvable:$false] %s1109_s6 }
  0x9e   : > { %s1111_s24 = scalar_lea.vmem %s1110_s6, 256  ;;  %p1112_p13 = scmp.lt.s32.totalorder %s1549_s29, %s1110_s6 }
  0x9f   : > { %p1107_p2 = pnand %p1105_p10, %p1468_p7  ;;  %p1113_p0 = scmp.lt.s32.totalorder %s1111_s24, %s1104_s8 }
  0xa1   : > { %p1108_p4 = pneg %p1107_p2  ;;  %p1114_p11 = por %p1113_p0, %p1112_p13 }
  0xa3   : > { %p1115_p6 = pnand %p1114_p11, %p1108_p4 }
  0xa5   : > { %1118 = shalt.err (!%p1115_p6)
}
  0xa6   : > { %p1769_p1 = scmp.ne.s32.totalorder %s1762_s17, 0  ;;  %s1119_s14 = scalar_lea.hbm %s1497_s3, 64 }
  0xa7   : > { %p1120_p3 = scmp.ne.s32.totalorder %s1497_s3, %s1119_s14  ;;  %s1124_s12 = scalar_lea.hbm %s1713_s2, 128 }
  0xa8   : > { %889 = dma.hbm_to_vmem [thread:$0]  (!%p1769_p1), %s1547_s7, 128, %s1549_s29, %s293_s19  }
  0xa9   : > { %p1122_p8 = pnand %p1120_p3, %p1468_p7  ;;  %p1125_p12 = scmp.lt.u32.totalorder %s1497_s3, %s1713_s2 }
  0xaa   : > { %p1126_p5 = scmp.lt.u32.totalorder %s1124_s12, %s1119_s14  ;;  %p1128_p2 = scmp.lt.u32.totalorder %s1119_s14, %s1497_s3 }
  0xab   : > { %p1123_p9 = pneg %p1122_p8 }
  0xac   : > { %p1127_p10 = por %p1126_p5, %p1125_p12 }
  0xae   : > { %p1129_p4 = por %p1128_p2, %p1127_p10 }
  0xb0   : > { %p1130_p13 = pnand %p1129_p4, %p1123_p9 }
  0xb2   : > { %1133 = shalt.err (!%p1130_p13)
}
  0xb3   : > { %s1134_s7 = scalar_lea.vmem %s343_s26, 64  ;;  %s1282_s29 = smov [#allocation7]  }
  0xb4   : > { %p1135_p0 = scmp.ne.s32.totalorder %s343_s26, %s1134_s7  ;;  %s1139_s13 = sshll.u32 %s1282_s29, 4  ;;  %s1140_s13 = int_to_ptr.vmem [resolvable:$false] %s1139_s13 }
  0xb5   : > { %s1141_s19 = scalar_lea.vmem %s1140_s13, 128  ;;  %p1142_p3 = scmp.lt.s32.totalorder %s343_s26, %s1140_s13 }
  0xb6   : > { %p1137_p11 = pnand %p1135_p0, %p1468_p7  ;;  %p1143_p8 = scmp.lt.s32.totalorder %s1141_s19, %s1134_s7 }
  0xb8   : > { %p1138_p6 = pneg %p1137_p11  ;;  %p1144_p1 = por %p1143_p8, %p1142_p3 }
  0xba   : > { %p1145_p5 = pnand %p1144_p1, %p1138_p6 }
  0xbc   : > { %1148 = shalt.err (!%p1145_p5)
}
  0xbd   : > { %p1770_p12 = scmp.ne.s32.totalorder %s1762_s17, 0  ;;  %p1771_p9 = scmp.ne.s32.totalorder %s1751_s11, 0 }
  0xbe   : > { %s1601_s18 = sand.u32 (!%p1771_p9), 1, %s1259_s25   ;;  %p1772_p7 = scmp.ne.s32.totalorder (!%p1771_p9), %s1748_s9, 0 }
  0xbf   : > { %895 = dma.hbm_to_vmem [thread:$0]  (!%p1770_p12), %s1497_s3, 64, %s343_s26, %s1462_s16  }
  0xc0   : > { %351 = sbr.rel (%p1771_p9) target bundleno = 836 (0x344), region = 44  ;;  %s831_s20 = sshll.u32 (!%p1771_p9), %s1601_s18, 3 }
  0xc1   : > { %s354_s23 = scalar_lea.sflag (!%p1771_p9), [#allocation3], %s1601_s18  ;;  %s357_s8 = scalar_lea.vmem (!%p1771_p9), [#allocation2], %s831_s20 }
  0xc7   : > { %1230 = dma.done.wait (%p1772_p7), %s354_s23, 128  }
  0xc8   : > { %1232 = vsyncadd (%p1772_p7), %s354_s23, 4294967168  ;;  %s362_s11 = sand.u32 1, %s1358_s30   ;;  %s832_s17 = sshll.u32 %s1601_s18, 2 }
  0xc9   : > { %s363_s16 = scalar_lea.sflag [#allocation6], %s362_s11  ;;  %s366_s3 = scalar_lea.vmem [#allocation5], %s832_s17 }
  0xca   : > { %1234 = dma.done.wait (%p1772_p7), %s363_s16, 128  }
  0xcb   : > { %1236 = vsyncadd (%p1772_p7), %s363_s16, 4294967168  ;;  %s375_s26 = scalar_lea.vmem [#allocation7], %s832_s17  ;;  %p1773_p1 = scmp.eq.s32.totalorder %s1358_s30, 0 }
  0xcd   : > { %1238 = dma.done.wait (%p1773_p1), [#allocation9], 96   ;;  %p1774_p10 = pmov %p1773_p1 }
  0xce   : > { %p1775_p2 = pmov %p1773_p1 }
  0xcf   : > { %1240 = vsyncadd (%p1774_p10), [#allocation9], 4294967200 }
  0xd0   : > { %1242 = dma.done.wait (%p1775_p2), [#allocation12], 64   ;;  %p1776_p4 = pmov %p1773_p1 }
  0xd1   : > { %v1283_v0 = vmov 0   ;;  %v437_v1 = vld [vmem:[%s366_s3] sm:$0xf]  ;;  %v448_v2 = vld [vmem:[%s375_s26] sm:$0xf]  ;;  %v436_v5 = vld [vmem:[%s357_s8] sm:$0xff] }
  0xd2   : > { %1244 = vsyncadd (%p1776_p4), [#allocation12], 4294967232  ;;  %964 = vset.pattern.permute.xlu0 %v1283_v0  ;;  %516 = vmatprep.mubr.bf16.mxu0 %v1283_v0  ;;  %v467_v3 = vld [vmem:[#allocation10] sm:$0xf]  ;;  %v533_v4 = vld [vmem:[#allocation11] sm:$0xf]  ;;  %v444_v6 = vcombine.high %v436_v5, %v436_v5 }
  0xd3   : > { %965 = vset.pattern.permute.xlu1 %v1283_v0  ;;  %440 = vperm.xlu0 %964, %v437_v1   ;;  %vm477_vm0 = vcmask 1041408   ;;  %v464_v24 = vld [vmem:[#allocation8] sm:$0x3]  ;;  %vm473_vm1 = vcmask 31744   ;;  %vm550_vm2 = vcmask 1043456   ;;  %s425_s30 = scalar_lea.vmem [#allocation13], %s831_s20 }
  0xd4   : > { %470 = vperm.xlu1 %965, %v467_v3   ;;  %s1777_s9 = sld [smem:[#allocation27_spill]]  ;;  %s838_s1 = sshll.u32 %s1601_s18, 1  ;;  %v1284_v54 = vmov 0.0  }
  0xd5   : > { %s1628_s6 = scalar_lea.vmem [#allocation14], %s838_s1  ;;  %s849_s24 = sshll.u32 %s1267_s27, 7 }
  0xd6   : > { %583 = vst [vmem:[%s1628_s6] sm:$0x3] %v1284_v54  ;;  %s615_s14 = sshll.u32 %s425_s30, 4  ;;  %s1778_s12 = sld [smem:[#allocation31_spill]]  ;;  %s616_s14 = int_to_ptr.vmem [resolvable:$true] %s615_s14 }
  0xd7   : > { %451 = vperm.xlu0 %964, %v448_v2   ;;  %s594_s10 = scalar_lea.sflag [#allocation4], %s1601_s18  ;;  %s1149_s7 = scalar_lea.vmem %s616_s14, 128 }
  0xd8   : > { %536 = vperm.xlu1 %965, %v533_v4   ;;  %p1150_p13 = scmp.ne.s32.totalorder %s616_s14, %s1149_s7  ;;  %s1285_s29 = smov [#allocation13]  }
  0xd9   : > { %s1153_s13 = sshll.u32 %s1285_s29, 4  ;;  %s1154_s13 = int_to_ptr.vmem [resolvable:$false] %s1153_s13 }
  0xda   : > { %p1779_p0 = scmp.ne.s32.totalorder %s1777_s9, 0  ;;  %s1155_s19 = scalar_lea.vmem %s1154_s13, 256 }
  0xdb   : > { %p1156_p3 = scmp.lt.s32.totalorder %s616_s14, %s1154_s13  ;;  %p1157_p8 = scmp.lt.s32.totalorder %s1155_s19, %s1149_s7 }
  0xdc   : > { %s1635_s15 = scalar_lea.hbm %s1778_s12, %s849_s24  ;;  %p1151_p11 = pnand %p1150_p13, %p1779_p0 }
  0xdd   : > { %p1158_p5 = por %p1157_p8, %p1156_p3 }
  0xde   : > { %p1152_p6 = pneg %p1151_p11 }
  0xe0   : > { %p1159_p12 = pnand %p1158_p5, %p1152_p6 }
 0x152   : > { %v441_v7 = vpop.permute.xlu0 %440 }
 0x153   : > { %v446_v8 = vmul.f32 %v441_v7, %v436_v5  ;;  %v447_v9 = vmul.f32 %v444_v6, %v441_v7  ;;  %v471_v25 = vpop.permute.xlu1 %470 }
 0x156   : > { %v452_v10 = vpop.permute.xlu0 %451 }
 0x157   : > { %v454_v11 = vadd.f32 %v452_v10, %v446_v8  ;;  %v455_v12 = vadd.f32 %v452_v10, %v447_v9  ;;  %v537_v39 = vpop.permute.xlu1 %536 }
 0x159   : > { %v456_v13 = vmul.f32 0.5, %v454_v11  ;;  %v457_v14 = vmul.f32 0.5, %v455_v12 }
 0x15b   : > { %967 = vtanh.f32 %v456_v13 }
 0x15c   : > { %969 = vtanh.f32 %v457_v14 }
 0x165   : > { %v968_v15 = vpop.eup %967 }
 0x166   : > { %v970_v16 = vpop.eup %969  ;;  %v460_v17 = vadd.f32 1.0, %v968_v15 }
 0x167   : > { %v461_v18 = vadd.f32 1.0, %v970_v16 }
 0x168   : > { %v462_v19 = vmul.f32 %v460_v17, %v456_v13 }
 0x169   : > { %v463_v20 = vmul.f32 %v461_v18, %v457_v14 }
 0x16a   : > { %v465_v21 = vpack.c.bf16 %v462_v19, %v462_v19 }
 0x16b   : > { %v466_v22 = vpack.c.bf16 %v463_v20, %v463_v20 }
 0x16c   : > { %v479_v23 = vsel %vm477_vm0, %v465_v21, 0 }
 0x16d   : > { %839 = vmatprep.subr.msk.bf16.mxu0 %vm477_vm0, %v466_v22 }
 0x16e   : > { %485 = vmatpush1.bf16.msra.mxu0 %v479_v23 }
 0x171   : > { %840 = vmatmul.mubr.msk.bf16.vlgmr.msra.gmra.mrb[0].mxu0 %vm473_vm1, %v464_v24 }
 0x244   : > { %v518_v26 = vpop.f32.mrb[0].mxu0 }
 0x245   : > { %v519_v27 = vadd.f32 %v518_v26, %v471_v25  ;;  %v520_v28 = vpop.f32.mrb[1].mxu0 }
 0x246   : > { %v521_v29 = vadd.f32 %v520_v28, %v471_v25  ;;  %v522_v30 = vpop.f32.mrb[2].mxu0 }
 0x247   : > { %v525_v31 = vmul.f32 0.5, %v519_v27  ;;  %v523_v32 = vpop.f32.mrb[3].mxu0 }
 0x248   : > { %v526_v33 = vmul.f32 0.5, %v521_v29 }
 0x249   : > { %971 = vtanh.f32 %v525_v31 }
 0x24a   : > { %973 = vtanh.f32 %v526_v33 }
 0x253   : > { %v972_v34 = vpop.eup %971 }
 0x254   : > { %v974_v35 = vpop.eup %973  ;;  %v529_v36 = vadd.f32 1.0, %v972_v34 }
 0x255   : > { %v530_v37 = vadd.f32 1.0, %v974_v35 }
 0x256   : > { %v531_v38 = vmul.f32 %v529_v36, %v525_v31 }
 0x257   : > { %v532_v40 = vmul.f32 %v530_v37, %v526_v33 }
 0x258   : > { %v539_v41 = vmul.f32 %v537_v39, %v531_v38 }
 0x259   : > { %v540_v42 = vmul.f32 %v537_v39, %v532_v40 }
 0x25b   : > { %v543_v43 = vcombine.low %v539_v41, %v540_v42 }
 0x25d   : > { %v545_v44 = vadd.f32 %v543_v43, %v436_v5 }
 0x25f   : > { %v548_v45 = vcombine.high %v545_v44, %v545_v44  ;;  %v563_v46 = vmul.f32 %v545_v44, %v545_v44  ;;  %546 = vst [vmem:[%s425_s30] sm:$0xff] %v545_v44  ;;  %v551_v47 = vsel %vm550_vm2, %v545_v44, 0.0 }
 0x261   : > { %v552_v48 = vsel %vm550_vm2, %v548_v45, 0.0  ;;  %v565_v49 = vcombine.high %v563_v46, %v563_v46  ;;  %v567_v51 = vsel %vm550_vm2, %v563_v46, 0.0 }
 0x262   : > { %v553_v50 = vadd.f32 %v552_v48, %v551_v47 }
 0x263   : > { %v568_v52 = vsel %vm550_vm2, %v565_v49, 0.0 }
 0x264   : > { %554 = vadd.xlane.f32.xlu0 %v553_v50  ;;  %v569_v53 = vadd.f32 %v568_v52, %v567_v51 }
 0x266   : > { %570 = vadd.xlane.f32.xlu1 %v569_v53 }
 0x267   : > { %1162 = shalt.err (!%p1159_p12)
}
 0x268   : > { %s1163_s20 = scalar_lea.hbm %s1635_s15, 128  ;;  %s1167_s11 = scalar_lea.hbm %s1778_s12, 256 }
 0x269   : > { %p1164_p9 = scmp.ne.s32.totalorder %s1635_s15, %s1163_s20  ;;  %p1168_p10 = scmp.lt.u32.totalorder %s1635_s15, %s1778_s12 }
 0x26a   : > { %p1169_p2 = scmp.lt.u32.totalorder %s1167_s11, %s1163_s20  ;;  %p1171_p13 = scmp.lt.u32.totalorder %s1163_s20, %s1635_s15 }
 0x26b   : > { %p1165_p7 = pnand %p1164_p9, %p1779_p0 }
 0x26c   : > { %p1170_p4 = por %p1169_p2, %p1168_p10 }
 0x26d   : > { %p1166_p1 = pneg %p1165_p7 }
 0x26e   : > { %p1172_p11 = por %p1171_p13, %p1170_p4 }
 0x270   : > { %p1173_p6 = pnand %p1172_p11, %p1166_p1 }
 0x272   : > { %1176 = shalt.err (!%p1173_p6)
}
 0x273   : > { %872 = dma.vmem_to_hbm [thread:$0]  (%p1779_p0), %s616_s14, 128, %s1635_s15, %s594_s10   ;;  %v584_v5 = vlaneseq  ;;  %v586_v7 = vld [vmem:[%s1628_s6] sm:$0x3] }
 0x274   : > { %s845_s26 = sshll.u32 %s1267_s27, 5  ;;  %s628_s1 = sshll.u32 %s1628_s6, 4  ;;  %s1663_s1 = int_to_ptr.vmem [resolvable:$true] %s628_s1 }
 0x275   : > { %v585_v6 = vshrl.u32 %v584_v5, 7  ;;  %s1780_s22 = sld [smem:[#allocation32_spill]]  ;;  %s599_s15 = scalar_lea.sflag [#allocation15], %s1601_s18 }
 0x276   : > { %s1177_s27 = scalar_lea.vmem %s1663_s1, 32  ;;  %s1286_s10 = smov [#allocation14]  }
 0x277   : > { %vm587_vm3 = vcmp.eq.s32.totalorder %v585_v6, 0  ;;  %p1178_p3 = scmp.ne.s32.totalorder %s1663_s1, %s1177_s27  ;;  %s1181_s7 = sshll.u32 %s1286_s10, 4  ;;  %s1182_s7 = int_to_ptr.vmem [resolvable:$false] %s1181_s7 }
 0x278   : > { %s1183_s29 = scalar_lea.vmem %s1182_s7, 64  ;;  %p1184_p12 = scmp.lt.s32.totalorder %s1663_s1, %s1182_s7 }
 0x279   : > { %p1179_p8 = pnand %p1178_p3, %p1779_p0  ;;  %p1185_p9 = scmp.lt.s32.totalorder %s1183_s29, %s1177_s27 }
 0x27b   : > { %s1661_s21 = scalar_lea.hbm %s1780_s22, %s845_s26  ;;  %p1180_p5 = pneg %p1179_p8 }
 0x27c   : > { %p1186_p7 = por %p1185_p9, %p1184_p12 }
 0x27e   : > { %p1187_p1 = pnand %p1186_p7, %p1180_p5 }
 0x2f1   : > { %v555_v55 = vpop.xlane.xlu0 %554 }
 0x2f2   : > { %v556_v56 = vrot.slane %v555_v55, 4 }
 0x2f3   : > { %v571_v57 = vpop.xlane.xlu1 %570 }
 0x2f4   : > { %v557_v58 = vadd.f32 %v556_v56, %v555_v55  ;;  %v572_v59 = vrot.slane %v571_v57, 4 }
 0x2f6   : > { %v558_v60 = vrot.slane %v557_v58, 2  ;;  %v573_v61 = vadd.f32 %v572_v59, %v571_v57 }
 0x2f8   : > { %v574_v62 = vrot.slane %v573_v61, 2  ;;  %v559_v63 = vadd.f32 %v558_v60, %v557_v58 }
 0x2fa   : > { %v575_v0 = vadd.f32 %v574_v62, %v573_v61  ;;  %v560_v1 = vrot.slane %v559_v63, 1 }
 0x2fc   : > { %v561_v2 = vadd.f32 %v560_v1, %v559_v63  ;;  %v576_v3 = vrot.slane %v575_v0, 1 }
 0x2fe   : > { %850 = vpush %v561_v2  ;;  %v577_v4 = vadd.f32 %v576_v3, %v575_v0 }
 0x300   : > { %852 = vpush %v577_v4 }
 0x32f   : > { %s851_s3 = spop %850 }
 0x330   : > { %v588_v8 = vstv %s851_s3 }
 0x331   : > { %s853_s30 = spop %852 }
 0x332   : > { %v589_v9 = vstv %s853_s30 }
 0x333   : > { %v590_v10 = vsel %vm587_vm3, %v588_v8, %v589_v9 }
 0x334   : > { %v591_v11 = vadd.f32 %v590_v10, %v586_v7 }
 0x336   : > { %592 = vst [vmem:[%s1628_s6] sm:$0x3] %v591_v11 }
 0x337   : > { %1190 = shalt.err (!%p1187_p1)
}
 0x338   : > { %s1191_s18 = scalar_lea.hbm %s1661_s21, 32  ;;  %s1195_s19 = scalar_lea.hbm %s1780_s22, 64 }
 0x339   : > { %p1192_p10 = scmp.ne.s32.totalorder %s1661_s21, %s1191_s18  ;;  %p1196_p13 = scmp.lt.u32.totalorder %s1661_s21, %s1780_s22 }
 0x33a   : > { %p1197_p11 = scmp.lt.u32.totalorder %s1195_s19, %s1191_s18  ;;  %p1199_p3 = scmp.lt.u32.totalorder %s1191_s18, %s1661_s21 }
 0x33b   : > { %p1193_p2 = pnand %p1192_p10, %p1779_p0 }
 0x33c   : > { %p1198_p6 = por %p1197_p11, %p1196_p13 }
 0x33d   : > { %p1194_p4 = pneg %p1193_p2 }
 0x33e   : > { %p1200_p8 = por %p1199_p3, %p1198_p6 }
 0x340   : > { %p1201_p5 = pnand %p1200_p8, %p1194_p4 }
 0x342   : > { %1204 = shalt.err (!%p1201_p5)
}
 0x343   : > { %873 = dma.vmem_to_hbm [thread:$0]  (%p1779_p0), %s1663_s1, 32, %s1661_s21, %s599_s15  }
 0x344 PF: > { %s1781_s8 = sld [smem:[#allocation22_spill]]  ;;  %s1782_s11 = sld [smem:[#allocation25_spill]] }
 0x345   : > { %s1783_s17 = sld [smem:[#allocation24_spill]] }
 0x34a   : > { %s640_s16 = sand.u32 1, %s1781_s8   ;;  %p1784_p12 = scmp.ne.s32.totalorder %s1782_s11, 0 }
 0x34b   : > { %p1785_p9 = scmp.ge.s32.totalorder %s1783_s17, 2  ;;  %s641_s3 = scalar_lea.sflag [#allocation4], %s640_s16 }
 0x34d   : > { %p897_p7 = pnand %p1785_p9, %p1784_p12 }
 0x34f   : > { %1246 = dma.done.wait (!%p897_p7), %s641_s3, 128  }
 0x350   : > { %1248 = vsyncadd (!%p897_p7), %s641_s3, 4294967168  ;;  %s650_s26 = scalar_lea.sflag [#allocation15], %s640_s16 }
 0x351   : > { %1250 = dma.done.wait (!%p897_p7), %s650_s26, 32  }
 0x352   : > { %1252 = vsyncadd (!%p897_p7), %s650_s26, 4294967264  ;;  %s32_s29 = sadd.s32 1, %s1783_s17   ;;  %s1786_s9 = sld [smem:[#allocation23_spill]] }
 0x353   : > { %p29_p1 = scmp.ge.s32.totalorder %s32_s29, 4   ;;  %s1787_s26 = sld [smem:[#allocation28_spill]] }
 0x354   : > { %s1788_s30 = sld [smem:[#allocation26_spill]]  ;;  %s1789_s24 = smov %s1259_s25 }
 0x355   : > { %s1791_s27 = smov %s1271_s28  ;;  %31 = sbr.rel (!%p29_p1) target bundleno = 17 (0x11), region = 146 }
 0x358   : > { %s1790_s25 = smov %s1786_s9 }
 0x35a   : > { %s1792_s28 = smov %s1788_s30 }
 0x35c   :  { %655 = vsyncpa [#allocation3], 1 }
 0x35d   :  { %657 = vsyncpa [#allocation3 + $0x1], 1 }
 0x35e   :  { %658 = vsyncpa [#allocation6], 1 }
 0x35f   :  { %660 = vsyncpa [#allocation6 + $0x1], 1 }
 0x360   :  { %661 = vsyncpa [#allocation9], 1 }
 0x361   :  { %662 = vsyncpa [#allocation12], 1 }
 0x362   :  { %663 = vsyncpa [#allocation4], 1 }
 0x363   :  { %665 = vsyncpa [#allocation4 + $0x1], 1 }
 0x364   :  { %666 = vsyncpa [#allocation15], 1 }
 0x365   :  { %668 = vsyncpa [#allocation15 + $0x1], 1 }

// kernel: light_mlp_block.3
= control target key start
LH: loop header
LB: loop body
LE: loop exit
PB: predicated region body
PF: predicated region fallthrough
CT: control target
= control target key end

     0   :  { %s1850_s0 = inlined_call_operand.hbm [shape: f32[2,4,256], index: 0, kind: input, shape index: {}]   ;;  %s1851_s1 = inlined_call_operand.hbm [shape: f32[2,4,1], index: 1, kind: input, shape index: {}]   ;;  %s1852_s2 = inlined_call_operand.hbm [shape: f32[2,4,1], index: 2, kind: input, shape index: {}]   ;;  %s1853_s3 = inlined_call_operand.hbm [shape: bf16[16,4], index: 3, kind: input, shape index: {}]   ;;  %s1854_s4 = inlined_call_operand.hbm [shape: f32[16,1], index: 4, kind: input, shape index: {}]   ;;  %s1855_s5 = inlined_call_operand.hbm [shape: bf16[4,16], index: 5, kind: input, shape index: {}]   ;;  %s1856_s6 = inlined_call_operand.hbm [shape: f32[4,1], index: 6, kind: input, shape index: {}]   ;;  %s1857_s7 = inlined_call_operand.hbm [shape: f32[4,1], index: 7, kind: input, shape index: {}]   ;;  %s1858_s8 = inlined_call_operand.hbm [shape: f32[2,4,256], index: 8, kind: output, shape index: {}]  }
   0x1   :  { %1882 = sst [smem:[#allocation31_spill]] %s1851_s1 }
   0x2   :  { %1883 = sst [smem:[#allocation32_spill]] %s1853_s3 }
   0x3   :  { %1884 = sst [smem:[#allocation33_spill]] %s1855_s5 }
   0x4   :  { %1885 = sst [smem:[#allocation34_spill]] %s1858_s8 }
   0x5   :  { %13 = vsyncpa [#allocation3], 0 }
   0x6   :  { %15 = vsyncpa [#allocation3 + $0x1], 0 }
   0x7   :  { %16 = vsyncpa [#allocation6], 0 }
   0x8   :  { %18 = vsyncpa [#allocation6 + $0x1], 0 }
   0x9   :  { %19 = vsyncpa [#allocation9], 0 }
   0xa   :  { %20 = vsyncpa [#allocation12], 0 }
   0xb   :  { %21 = vsyncpa [#allocation15], 0 }
   0xc   :  { %22 = vsyncpa [#allocation4], 0 }
   0xd   :  { %24 = vsyncpa [#allocation4 + $0x1], 0  ;;  %s1438_s27 = smov 0   ;;  %s1440_s28 = smov 0  }
   0xe   :  { %s1442_s29 = smov 0   ;;  %s1444_s30 = smov 0  }
   0xf   :  { %s1446_s9 = smov 0   ;;  %s1448_s10 = smov 0  }
  0x10 LB: > { %1886 = sst [smem:[#allocation23_spill]] %s1357_s27  ;;  %s1469_s11 = sadd.s32 4294967295, %s1377_s10   ;;  %s1377_s10 = sphi %s1448_s10, %s30_s10   ;;  %s1373_s9 = sphi %s1446_s9, %s1936_s9   ;;  %s1369_s30 = sphi %s1444_s30, %s1935_s30   ;;  %s1365_s29 = sphi %s1442_s29, %s1931_s29   ;;  %s1361_s28 = sphi %s1440_s28, %s1934_s28   ;;  %s1357_s27 = sphi %s1438_s27, %s1933_s27  }
  0x11   : > { %1887 = sst [smem:[#allocation24_spill]] %s1365_s29  ;;  %p874_p0 = scmp.ge.s32.totalorder %s1377_s10, 1 }
  0x12   : > { %1888 = sst [smem:[#allocation25_spill]] %s1369_s30  ;;  %p1860_p1 = scmp.eq.s32.totalorder %s1469_s11, 0 }
  0x13   : > { %1889 = sst [smem:[#allocation26_spill]] %s1377_s10  ;;  %p260_p2 = scmp.lt.s32.totalorder %s1377_s10, 3 }
  0x14   : > { %s1379_s13 = smov [#allocation8]   ;;  %s1380_s16 = smov [#allocation11]  }
  0x15   : > { %p1474_p3 = pnand %p874_p0, %p260_p2  ;;  %s272_s14 = sshll.u32 %s1379_s13, 4  ;;  %s1478_s14 = int_to_ptr.vmem [resolvable:$true] %s272_s14 }
  0x16   : > { %s299_s17 = sshll.u32 %s1380_s16, 4  ;;  %s1892_s3 = sld [smem:[#allocation32_spill]]  ;;  %s1489_s17 = int_to_ptr.vmem [resolvable:$true] %s299_s17 }
  0x17   : > { %s1890_s12 = scalar_select %p1474_p3, 1, 0 }
  0x18   : > { %p937_p4 = pneg %p1474_p3 }
  0x1a   : > { %p1485_p6 = pnand %p937_p4, %p1860_p1 }
  0x1c   : > { %s1891_s15 = scalar_select %p1485_p6, 1, 0 }
  0x1d   : > { %s1049_s20 = scalar_lea.hbm %s1892_s3, 128  ;;  %p1499_p8 = pneg %p1485_p6 }
  0x1e   : > { %p1050_p7 = scmp.ne.s32.totalorder %s1892_s3, %s1049_s20  ;;  %p1056_p11 = scmp.lt.u32.totalorder %s1049_s20, %s1892_s3 }
  0x1f   : > { %s1893_s23 = scalar_select %p1499_p8, 1, 0 }
  0x20   : > { %p1052_p9 = pnand %p1499_p8, %p1050_p7 }
  0x22   : > { %p1053_p10 = pneg %p1052_p9 }
  0x24   : > { %p1058_p12 = pnand %p1056_p11, %p1053_p10 }
  0x26   : > { %1061 = shalt.err (!%p1058_p12)
}
  0x27   : > { %s1062_s26 = scalar_lea.vmem %s1478_s14, 128  ;;  %p1070_p4 = scmp.lt.s32.totalorder %s1478_s14, %s1478_s14 }
  0x28   : > { %p1063_p13 = scmp.ne.s32.totalorder %s1478_s14, %s1062_s26  ;;  %p1071_p5 = scmp.lt.s32.totalorder %s1062_s26, %s1062_s26 }
  0x2a   : > { %p1065_p0 = pnand %p1063_p13, %p1499_p8  ;;  %p1072_p7 = por %p1071_p5, %p1070_p4 }
  0x2c   : > { %p1066_p2 = pneg %p1065_p0 }
  0x2e   : > { %p1073_p9 = pnand %p1072_p7, %p1066_p2 }
  0x30   : > { %1076 = shalt.err (!%p1073_p9)
}
  0x31   : > { %s1381_s13 = smov 64   ;;  %s1382_s16 = smov 4  }
  0x32   : > { %940 = dma.hbm_to_vmem [thread:$0]  (!%p1485_p6), %s1892_s3, 128, %s1478_s14, [#allocation9], %s1381_s13, %s1381_s13, %s1382_s16  }
  0x33   : > { %s1894_s5 = sld [smem:[#allocation33_spill]] }
  0x39   : > { %s1077_s22 = scalar_lea.hbm %s1894_s5, 32 }
  0x3a   : > { %p1078_p5 = scmp.ne.s32.totalorder %s1894_s5, %s1077_s22  ;;  %p1084_p12 = scmp.lt.u32.totalorder %s1077_s22, %s1894_s5 }
  0x3c   : > { %p1080_p10 = pnand %p1078_p5, %p1499_p8 }
  0x3e   : > { %p1081_p11 = pneg %p1080_p10 }
  0x40   : > { %p1086_p13 = pnand %p1084_p12, %p1081_p11 }
  0x42   : > { %1089 = shalt.err (!%p1086_p13)
}
  0x43   : > { %s1090_s14 = scalar_lea.vmem %s1489_s17, 32  ;;  %p1098_p7 = scmp.lt.s32.totalorder %s1489_s17, %s1489_s17 }
  0x44   : > { %p1091_p0 = scmp.ne.s32.totalorder %s1489_s17, %s1090_s14  ;;  %p1099_p9 = scmp.lt.s32.totalorder %s1090_s14, %s1090_s14 }
  0x46   : > { %p1093_p2 = pnand %p1091_p0, %p1499_p8  ;;  %p1100_p5 = por %p1099_p9, %p1098_p7 }
  0x48   : > { %p1094_p4 = pneg %p1093_p2 }
  0x4a   : > { %p1101_p10 = pnand %p1100_p5, %p1094_p4 }
  0x4c   : > { %1104 = shalt.err (!%p1101_p10)
}
  0x4d   : > { %946 = dma.hbm_to_vmem [thread:$0]  (!%p1485_p6), %s1894_s5, 32, %s1489_s17, [#allocation12]  }
  0x4e   : > { %s873_s16 = sadd.s32 4294967294, %s1377_s10   ;;  %s42_s18 = sadd.s32 1, %s1373_s9 }
  0x4f   : > { %p44_p11 = scmp.ge.s32.totalorder %s42_s18, 2  ;;  %s51_s19 = sadd.s32 1, %s1365_s29 }
  0x50   : > { %p58_p12 = scmp.ne.s32.totalorder %s1365_s29, %s1361_s28  ;;  %p59_p13 = scmp.eq.s32.totalorder %s1377_s10, 0 }
  0x51   : > { %s1938_s18 = smov (%p44_p11, %s42_s18), 0  ;;  %p64_p2 = scmp.ne.s32.totalorder %s1361_s28, %s1357_s27 }
  0x52   : > { %1895 = sst [smem:[#allocation27_spill]] %s1938_s18  ;;  %p1551_p0 = por %p59_p13, %p58_p12 }
  0x53   : > { %s46_s17 = ssub.s32 %s1373_s9, %s1938_s18  ;;  %p247_p4 = scmp.eq.s32.totalorder %s1469_s11, 1 }
  0x54   : > { %p49_p7 = scmp.eq.s32.totalorder %s46_s17, 0  ;;  %p1562_p9 = por %p1860_p1, %p64_p2 }
  0x55   : > { %p1566_p5 = por %p247_p4, %p58_p12  ;;  %p253_p10 = scmp.eq.s32.totalorder %s873_s16, 1 }
  0x56   : > { %s1897_s21 = scalar_select %p1562_p9, 1, 0 }
  0x57   : > { %s1898_s22 = scalar_select %p1566_p5, 1, 0 }
  0x58   : > { %s1571_s24 = scalar_select %p49_p7, %s1365_s29, %s51_s19  }
  0x59   : > { %1899 = sst [smem:[#allocation28_spill]] %s1898_s22  ;;  %p1573_p11 = por %p253_p10, %p64_p2 }
  0x5a   : > { %1900 = sst [smem:[#allocation29_spill]] %s1571_s24  ;;  %p972_p13 = scmp.lt.s32.totalorder %s1377_s10, 2 }
  0x5b   : > { %s1901_s25 = scalar_select %p1573_p11, 1, 0 }
  0x5c   : > { %s1579_s26 = sand.u32 1, %s1365_s29   ;;  %s353_s14 = sand.u32 1, %s1377_s10  }
  0x5d   : > { %1902 = sst [smem:[#allocation30_spill]] %s1901_s25  ;;  %p1584_p1 = pnand %p972_p13, %p1551_p0 }
  0x5e   : > { %s1863_s13 = sshll.u32 %s1579_s26, 2  ;;  %s1864_s16 = sshll.u32 %s1373_s9, 6 }
  0x5f   : > { %s1903_s8 = scalar_select %p1584_p1, 1, 0 }
  0x60   : > { %s1904_s1 = sld [smem:[#allocation31_spill]]  ;;  %s357_s5 = scalar_lea.vmem [#allocation5], %s1863_s13 }
  0x61   : > { %s364_s20 = sshll.u32 %s357_s5, 4  ;;  %s1601_s18 = scalar_lea.sflag [#allocation6], %s353_s14  ;;  %s1599_s20 = int_to_ptr.vmem [resolvable:$true] %s364_s20 }
  0x62   : > { %p1607_p0 = pneg %p1584_p1 }
  0x64   : > { %s1905_s29 = scalar_select %p1607_p0, 1, 0 }
  0x66   : > { %s1595_s3 = scalar_lea.hbm %s1904_s1, %s1864_s16  ;;  %s1110_s13 = scalar_lea.hbm %s1904_s1, 128 }
  0x67   : > { %s1105_s24 = scalar_lea.hbm %s1595_s3, 64  ;;  %p1111_p7 = scmp.lt.u32.totalorder %s1595_s3, %s1904_s1 }
  0x68   : > { %p1106_p12 = scmp.ne.s32.totalorder %s1595_s3, %s1105_s24  ;;  %p1112_p10 = scmp.lt.u32.totalorder %s1110_s13, %s1105_s24 }
  0x69   : > { %p1114_p11 = scmp.lt.u32.totalorder %s1105_s24, %s1595_s3 }
  0x6a   : > { %p1108_p2 = pnand %p1607_p0, %p1106_p12  ;;  %p1113_p13 = por %p1112_p10, %p1111_p7 }
  0x6c   : > { %p1109_p4 = pneg %p1108_p2  ;;  %p1115_p5 = por %p1114_p11, %p1113_p13 }
  0x6e   : > { %p1116_p9 = pnand %p1115_p5, %p1109_p4 }
  0x70   : > { %1119 = shalt.err (!%p1116_p9)
}
  0x71   : > { %s1120_s14 = scalar_lea.vmem %s1599_s20, 64  ;;  %s1383_s19 = smov [#allocation5]  }
  0x72   : > { %p1121_p12 = scmp.ne.s32.totalorder %s1599_s20, %s1120_s14  ;;  %s1125_s17 = sshll.u32 %s1383_s19, 4  ;;  %s1126_s17 = int_to_ptr.vmem [resolvable:$false] %s1125_s17 }
  0x73   : > { %s1127_s16 = scalar_lea.vmem %s1126_s17, 128  ;;  %p1128_p6 = scmp.lt.s32.totalorder %s1599_s20, %s1126_s17 }
  0x74   : > { %p1123_p2 = pnand %p1121_p12, %p1607_p0  ;;  %p1129_p8 = scmp.lt.s32.totalorder %s1127_s16, %s1120_s14 }
  0x76   : > { %p1124_p3 = pneg %p1123_p2  ;;  %p1130_p7 = por %p1129_p8, %p1128_p6 }
  0x78   : > { %p1131_p10 = pnand %p1130_p7, %p1124_p3 }
  0x7a   : > { %1134 = shalt.err (!%p1131_p10)
}
  0x7b   : > { %959 = dma.hbm_to_vmem [thread:$0]  (!%p1584_p1), %s1595_s3, 64, %s1599_s20, %s1601_s18  }
  0x7c   : > { %s1906_s24 = sshll.u32 %s1373_s9, 6  ;;  %s1384_s1 = smov [#allocation10]  }
  0x7d   : > { %s1636_s19 = scalar_lea.hbm %s1852_s2, %s1906_s24  ;;  %s285_s17 = sshll.u32 %s1384_s1, 4  ;;  %s286_s17 = int_to_ptr.vmem [resolvable:$true] %s285_s17 }
  0x7e   : > { %s1135_s10 = scalar_lea.hbm %s1854_s4, 256  ;;  %p1907_p6 = scmp.ne.s32.totalorder %s1893_s23, 0 }
  0x7f   : > { %p1136_p3 = scmp.ne.s32.totalorder %s1854_s4, %s1135_s10  ;;  %p1142_p5 = scmp.lt.u32.totalorder %s1135_s10, %s1854_s4 }
  0x81   : > { %p1138_p8 = pnand %p1136_p3, %p1907_p6 }
  0x83   : > { %p1139_p9 = pneg %p1138_p8 }
  0x85   : > { %p1144_p11 = pnand %p1142_p5, %p1139_p9 }
  0x87   : > { %1147 = shalt.err (!%p1144_p11)
}
  0x88   : > { %s1148_s24 = scalar_lea.vmem %s286_s17, 256  ;;  %p1156_p2 = scmp.lt.s32.totalorder %s286_s17, %s286_s17 }
  0x89   : > { %p1149_p4 = scmp.ne.s32.totalorder %s286_s17, %s1148_s24  ;;  %p1157_p7 = scmp.lt.s32.totalorder %s1148_s24, %s1148_s24 }
  0x8b   : > { %p1151_p13 = pnand %p1149_p4, %p1907_p6  ;;  %p1158_p10 = por %p1157_p7, %p1156_p2 }
  0x8d   : > { %p1152_p12 = pneg %p1151_p13 }
  0x8f   : > { %p1159_p1 = pnand %p1158_p10, %p1152_p12 }
  0x91   : > { %1162 = shalt.err (!%p1159_p1)
}
  0x92   : > { %s1385_s1 = smov 128   ;;  %s1386_s27 = smov 8  }
  0x93   : > { %p1908_p3 = scmp.ne.s32.totalorder %s1891_s15, 0  ;;  %s1387_s13 = smov [#allocation13]  }
  0x94   : > { %s310_s5 = sshll.u32 %s1387_s13, 4  ;;  %s1388_s14 = smov [#allocation14]   ;;  %s311_s5 = int_to_ptr.vmem [resolvable:$true] %s310_s5 }
  0x95   : > { %943 = dma.hbm_to_vmem [thread:$0]  (!%p1908_p3), %s1854_s4, 256, %s286_s17, [#allocation9], %s1385_s1, %s1385_s1, %s1386_s27  }
  0x96   : > { %s321_s16 = sshll.u32 %s1388_s14, 4  ;;  %s1163_s24 = scalar_lea.hbm %s1856_s6, 64  ;;  %s1656_s16 = int_to_ptr.vmem [resolvable:$true] %s321_s16 }
  0x97   : > { %p1164_p1 = scmp.ne.s32.totalorder %s1856_s6, %s1163_s24  ;;  %p1170_p5 = scmp.lt.u32.totalorder %s1163_s24, %s1856_s6 }
  0x99   : > { %p1166_p8 = pnand %p1164_p1, %p1907_p6 }
  0x9b   : > { %p1167_p9 = pneg %p1166_p8 }
  0x9d   : > { %p1172_p11 = pnand %p1170_p5, %p1167_p9 }
  0x9f   : > { %1175 = shalt.err (!%p1172_p11)
}
  0xa0   : > { %s1176_s1 = scalar_lea.vmem %s311_s5, 64  ;;  %p1184_p2 = scmp.lt.s32.totalorder %s311_s5, %s311_s5 }
  0xa1   : > { %p1177_p4 = scmp.ne.s32.totalorder %s311_s5, %s1176_s1  ;;  %p1185_p7 = scmp.lt.s32.totalorder %s1176_s1, %s1176_s1 }
  0xa3   : > { %p1179_p13 = pnand %p1177_p4, %p1907_p6  ;;  %p1186_p10 = por %p1185_p7, %p1184_p2 }
  0xa5   : > { %p1180_p12 = pneg %p1179_p13 }
  0xa7   : > { %p1187_p0 = pnand %p1186_p10, %p1180_p12 }
  0xa9   : > { %1190 = shalt.err (!%p1187_p0)
}
  0xaa   : > { %949 = dma.hbm_to_vmem [thread:$0]  (!%p1908_p3), %s1856_s6, 64, %s311_s5, [#allocation12]  }
  0xab   : > { %s1191_s13 = scalar_lea.hbm %s1857_s7, 64 }
  0xac   : > { %p1192_p1 = scmp.ne.s32.totalorder %s1857_s7, %s1191_s13  ;;  %p1198_p0 = scmp.lt.u32.totalorder %s1191_s13, %s1857_s7 }
  0xae   : > { %p1194_p8 = pnand %p1192_p1, %p1907_p6 }
  0xb0   : > { %p1195_p9 = pneg %p1194_p8 }
  0xb2   : > { %p1200_p5 = pnand %p1198_p0, %p1195_p9 }
  0xb4   : > { %1203 = shalt.err (!%p1200_p5)
}
  0xb5   : > { %s1204_s5 = scalar_lea.vmem %s1656_s16, 64  ;;  %p1212_p12 = scmp.lt.s32.totalorder %s1656_s16, %s1656_s16 }
  0xb6   : > { %p1205_p11 = scmp.ne.s32.totalorder %s1656_s16, %s1204_s5  ;;  %p1213_p2 = scmp.lt.s32.totalorder %s1204_s5, %s1204_s5 }
  0xb8   : > { %p1207_p4 = pnand %p1205_p11, %p1907_p6  ;;  %p1214_p7 = por %p1213_p2, %p1212_p12 }
  0xba   : > { %p1208_p13 = pneg %p1207_p4 }
  0xbc   : > { %p1215_p10 = pnand %p1214_p7, %p1208_p13 }
  0xbe   : > { %1218 = shalt.err (!%p1215_p10)
}
  0xbf   : > { %952 = dma.hbm_to_vmem [thread:$0]  (!%p1908_p3), %s1857_s7, 64, %s1656_s16, [#allocation15]  }
  0xc0   : > { %s881_s23 = sshll.u32 %s1579_s26, 3  ;;  %s907_s1 = sshll.u32 %s1373_s9, 7 }
  0xc1   : > { %s1704_s27 = scalar_lea.hbm %s1850_s0, %s907_s1  ;;  %s336_s15 = scalar_lea.vmem [#allocation2], %s881_s23 }
  0xc2   : > { %s346_s10 = sshll.u32 %s336_s15, 4  ;;  %s1909_s13 = sshll.u32 %s1579_s26, 2  ;;  %s1706_s10 = int_to_ptr.vmem [resolvable:$true] %s346_s10 }
  0xc3   : > { %s1710_s14 = scalar_lea.vmem [#allocation7], %s1909_s13  ;;  %s333_s3 = scalar_lea.sflag [#allocation3], %s1579_s26 }
  0xc4   : > { %s382_s16 = sshll.u32 %s1710_s14, 4  ;;  %s1219_s20 = scalar_lea.hbm %s1704_s27, 128  ;;  %s383_s16 = int_to_ptr.vmem [resolvable:$true] %s382_s16 }
  0xc5   : > { %p1220_p6 = scmp.ne.s32.totalorder %s1704_s27, %s1219_s20  ;;  %p1910_p3 = scmp.ne.s32.totalorder %s1905_s29, 0 }
  0xc6   : > { %s1224_s25 = scalar_lea.hbm %s1850_s0, 256  ;;  %p1225_p9 = scmp.lt.u32.totalorder %s1704_s27, %s1850_s0 }
  0xc7   : > { %p1222_p1 = pnand %p1220_p6, %p1910_p3  ;;  %p1226_p0 = scmp.lt.u32.totalorder %s1224_s25, %s1219_s20 }
  0xc8   : > { %p1228_p11 = scmp.lt.u32.totalorder %s1219_s20, %s1704_s27 }
  0xc9   : > { %p1223_p8 = pneg %p1222_p1  ;;  %p1227_p5 = por %p1226_p0, %p1225_p9 }
  0xcb   : > { %p1229_p4 = por %p1228_p11, %p1227_p5 }
  0xcd   : > { %p1230_p13 = pnand %p1229_p4, %p1223_p8 }
  0xcf   : > { %1233 = shalt.err (!%p1230_p13)
}
  0xd0   : > { %s1234_s26 = scalar_lea.vmem %s1706_s10, 128  ;;  %s1389_s1 = smov [#allocation2]  }
  0xd1   : > { %p1235_p12 = scmp.ne.s32.totalorder %s1706_s10, %s1234_s26  ;;  %s1239_s30 = sshll.u32 %s1389_s1, 4  ;;  %s1240_s30 = int_to_ptr.vmem [resolvable:$false] %s1239_s30 }
  0xd2   : > { %s1241_s22 = scalar_lea.vmem %s1240_s30, 256  ;;  %p1242_p10 = scmp.lt.s32.totalorder %s1706_s10, %s1240_s30 }
  0xd3   : > { %p1237_p2 = pnand %p1235_p12, %p1910_p3  ;;  %p1243_p6 = scmp.lt.s32.totalorder %s1241_s22, %s1234_s26 }
  0xd5   : > { %p1238_p7 = pneg %p1237_p2  ;;  %p1244_p1 = por %p1243_p6, %p1242_p10 }
  0xd7   : > { %p1245_p9 = pnand %p1244_p1, %p1238_p7 }
  0xd9   : > { %1248 = shalt.err (!%p1245_p9)
}
  0xda   : > { %p1911_p8 = scmp.ne.s32.totalorder %s1903_s8, 0  ;;  %s1249_s15 = scalar_lea.hbm %s1636_s19, 64 }
  0xdb   : > { %p1250_p0 = scmp.ne.s32.totalorder %s1636_s19, %s1249_s15  ;;  %s1254_s24 = scalar_lea.hbm %s1852_s2, 128 }
  0xdc   : > { %956 = dma.hbm_to_vmem [thread:$0]  (!%p1911_p8), %s1704_s27, 128, %s1706_s10, %s333_s3  }
  0xdd   : > { %p1252_p5 = pnand %p1250_p0, %p1910_p3  ;;  %p1255_p4 = scmp.lt.u32.totalorder %s1636_s19, %s1852_s2 }
  0xde   : > { %p1256_p13 = scmp.lt.u32.totalorder %s1254_s24, %s1249_s15  ;;  %p1258_p2 = scmp.lt.u32.totalorder %s1249_s15, %s1636_s19 }
  0xdf   : > { %p1253_p11 = pneg %p1252_p5 }
  0xe0   : > { %p1257_p12 = por %p1256_p13, %p1255_p4 }
  0xe2   : > { %p1259_p7 = por %p1258_p2, %p1257_p12 }
  0xe4   : > { %p1260_p10 = pnand %p1259_p7, %p1253_p11 }
  0xe6   : > { %1263 = shalt.err (!%p1260_p10)
}
  0xe7   : > { %s1264_s27 = scalar_lea.vmem %s383_s16, 64  ;;  %s1390_s10 = smov [#allocation7]  }
  0xe8   : > { %p1265_p6 = scmp.ne.s32.totalorder %s383_s16, %s1264_s27  ;;  %s1269_s14 = sshll.u32 %s1390_s10, 4  ;;  %s1270_s14 = int_to_ptr.vmem [resolvable:$false] %s1269_s14 }
  0xe9   : > { %s1271_s3 = scalar_lea.vmem %s1270_s14, 128  ;;  %p1272_p0 = scmp.lt.s32.totalorder %s383_s16, %s1270_s14 }
  0xea   : > { %p1267_p1 = pnand %p1265_p6, %p1910_p3  ;;  %p1273_p5 = scmp.lt.s32.totalorder %s1271_s3, %s1264_s27 }
  0xec   : > { %p1268_p9 = pneg %p1267_p1  ;;  %p1274_p8 = por %p1273_p5, %p1272_p0 }
  0xee   : > { %p1275_p4 = pnand %p1274_p8, %p1268_p9 }
  0xf0   : > { %1278 = shalt.err (!%p1275_p4)
}
  0xf1   : > { %p1912_p13 = scmp.ne.s32.totalorder %s1903_s8, 0  ;;  %p1913_p11 = scmp.ne.s32.totalorder %s1890_s12, 0 }
  0xf2   : > { %s1758_s29 = sand.u32 (!%p1913_p11), 1, %s1361_s28   ;;  %p1914_p3 = scmp.ne.s32.totalorder (!%p1913_p11), %s1897_s21, 0 }
  0xf3   : > { %962 = dma.hbm_to_vmem [thread:$0]  (!%p1912_p13), %s1636_s19, 64, %s383_s16, %s1601_s18  }
  0xf4   : > { %391 = sbr.rel (%p1913_p11) target bundleno = 890 (0x37a), region = 52  ;;  %s889_s17 = sshll.u32 (!%p1913_p11), %s1758_s29, 3 }
  0xf5   : > { %s394_s23 = scalar_lea.sflag (!%p1913_p11), [#allocation3], %s1758_s29  ;;  %s1764_s26 = scalar_lea.vmem (!%p1913_p11), [#allocation2], %s889_s17 }
  0xfb   : > { %1332 = dma.done.wait (%p1914_p3), %s394_s23, 128  }
  0xfc   : > { %1334 = vsyncadd (%p1914_p3), %s394_s23, 4294967168  ;;  %s402_s12 = sand.u32 1, %s1469_s11   ;;  %s890_s18 = sshll.u32 %s1758_s29, 2 }
  0xfd   : > { %s403_s8 = scalar_lea.sflag [#allocation6], %s402_s12  ;;  %s406_s19 = scalar_lea.vmem [#allocation5], %s890_s18 }
  0xfe   : > { %1336 = dma.done.wait (%p1914_p3), %s403_s8, 128  }
  0xff   : > { %1338 = vsyncadd (%p1914_p3), %s403_s8, 4294967168  ;;  %s415_s16 = scalar_lea.vmem [#allocation7], %s890_s18  ;;  %p1915_p8 = scmp.eq.s32.totalorder %s1469_s11, 0 }
 0x101   : > { %1340 = dma.done.wait (%p1915_p8), [#allocation9], 384   ;;  %p1916_p12 = pmov %p1915_p8 }
 0x102   : > { %p1917_p2 = pmov %p1915_p8 }
 0x103   : > { %1342 = vsyncadd (%p1916_p12), [#allocation9], 4294966912 }
 0x104   : > { %1344 = dma.done.wait (%p1917_p2), [#allocation12], 96   ;;  %p1918_p7 = pmov %p1917_p2 }
 0x105   : > { %p1919_p10 = pmov %p1917_p2 }
 0x106   : > { %1346 = vsyncadd (%p1918_p7), [#allocation12], 4294967200 }
 0x107   : > { %1348 = dma.done.wait (%p1919_p10), [#allocation15], 64   ;;  %p1920_p6 = pmov %p1917_p2 }
 0x108   : > { %v1391_v0 = vmov 0   ;;  %v482_v1 = vld [vmem:[%s406_s19] sm:$0xf]  ;;  %v493_v2 = vld [vmem:[%s415_s16] sm:$0xf]  ;;  %v505_v4 = vld [vmem:[#allocation10] sm:$0xff] }
 0x109   : > { %1350 = vsyncadd (%p1920_p6), [#allocation15], 4294967232  ;;  %1037 = vset.pattern.permute.xlu0 %v1391_v0  ;;  %565 = vmatprep.mubr.bf16.mxu0 %v1391_v0  ;;  %v615_v3 = vld [vmem:[#allocation13] sm:$0xf]  ;;  %v506_v5 = vld [vmem:[#allocation10 + $0x8] sm:$0xff]  ;;  %vm526_vm0 = vcmask 1041408  }
 0x10a   : > { %1038 = vset.pattern.permute.xlu1 %v1391_v0  ;;  %657 = vmatprep.mubr.bf16.mxu1 %v1391_v0  ;;  %v666_v6 = vld [vmem:[#allocation14] sm:$0xf]  ;;  %vm522_vm1 = vcmask 31744   ;;  %s1921_s11 = sld [smem:[#allocation25_spill]]  ;;  %vm621_vm2 = vcmask 130048   ;;  %s1922_s21 = sld [smem:[#allocation28_spill]] }
 0x10b   : > { %485 = vperm.xlu0 %1037, %v482_v1   ;;  %509 = vperm.xlu1 %1038, %v505_v4   ;;  %v1789_v7 = vld [vmem:[%s1764_s26] sm:$0xff]  ;;  %s477_s30 = scalar_lea.vmem [#allocation16], %s889_s17  ;;  %s1923_s20 = sld [smem:[#allocation34_spill]] }
 0x10c   : > { %v489_v8 = vcombine.high %v1789_v7, %v1789_v7  ;;  %v1040_v18 = vld [vmem:[#allocation8] sm:$0xff]   ;;  %s697_s22 = sshll.u32 %s477_s30, 4  ;;  %s681_s5 = scalar_lea.sflag [#allocation4], %s1758_s29  ;;  %s1803_s22 = int_to_ptr.vmem [resolvable:$true] %s697_s22 }
 0x10d   : > { %s1279_s25 = scalar_lea.vmem %s1803_s22, 128  ;;  %s1392_s27 = smov [#allocation16]  }
 0x10e   : > { %p1280_p1 = scmp.ne.s32.totalorder %s1803_s22, %s1279_s25  ;;  %s1283_s10 = sshll.u32 %s1392_s27, 4  ;;  %s1284_s10 = int_to_ptr.vmem [resolvable:$false] %s1283_s10 }
 0x10f   : > { %496 = vperm.xlu0 %1037, %v493_v2   ;;  %514 = vperm.xlu1 %1038, %v506_v5   ;;  %s1285_s14 = scalar_lea.vmem %s1284_s10, 256  ;;  %p1286_p4 = scmp.lt.s32.totalorder %s1803_s22, %s1284_s10 }
 0x110   : > { %s908_s1 = sshll.u32 %s1921_s11, 7  ;;  %p1924_p9 = scmp.ne.s32.totalorder %s1922_s21, 0 }
 0x111   : > { %s1801_s24 = scalar_lea.hbm %s1923_s20, %s908_s1  ;;  %p1287_p13 = scmp.lt.s32.totalorder %s1285_s14, %s1279_s25 }
 0x112   : > { %p1281_p0 = pnand %p1280_p1, %p1924_p9 }
 0x113   : > { %618 = vperm.xlu0 %1037, %v615_v3   ;;  %669 = vperm.xlu1 %1038, %v666_v6   ;;  %v614_v3 = vld [vmem:[#allocation11] sm:$0x3]  ;;  %p1288_p11 = por %p1287_p13, %p1286_p4 }
 0x114   : > { %p1282_p5 = pneg %p1281_p0 }
 0x116   : > { %p1289_p3 = pnand %p1288_p11, %p1282_p5 }
 0x18a   : > { %v486_v9 = vpop.permute.xlu0 %485  ;;  %v510_v19 = vpop.permute.xlu1 %509 }
 0x18b   : > { %v491_v10 = vmul.f32 %v486_v9, %v1789_v7  ;;  %v492_v11 = vmul.f32 %v489_v8, %v486_v9 }
 0x18e   : > { %v497_v12 = vpop.permute.xlu0 %496  ;;  %v515_v23 = vpop.permute.xlu1 %514 }
 0x18f   : > { %v499_v13 = vadd.f32 %v497_v12, %v491_v10  ;;  %v500_v14 = vadd.f32 %v497_v12, %v492_v11 }
 0x191   : > { %v501_v15 = vpack.c.bf16 %v499_v13, %v499_v13  ;;  %v502_v16 = vpack.c.bf16 %v500_v14, %v500_v14 }
 0x192   : > { %v619_v4 = vpop.permute.xlu0 %618  ;;  %v670_v9 = vpop.permute.xlu1 %669 }
 0x193   : > { %899 = vmatprep.subr.msk.bf16.mxu0 %vm526_vm0, %v502_v16  ;;  %v528_v17 = vsel %vm526_vm0, %v501_v15, 0 }
 0x194   : > { %534 = vmatpush1.bf16.msra.mxu0 %v528_v17 }
 0x197   : > { %900 = vmatmul.mubr.msk.bf16.vlgmr.msra.gmra.mrb[0].mxu0 %vm522_vm1, %v1040_v18 }
 0x26a   : > { %v567_v20 = vpop.f32.mrb[0].mxu0 }
 0x26b   : > { %v568_v21 = vadd.f32 %v567_v20, %v510_v19  ;;  %v569_v22 = vpop.f32.mrb[1].mxu0 }
 0x26c   : > { %v570_v24 = vadd.f32 %v569_v22, %v510_v19  ;;  %v571_v25 = vpop.f32.mrb[2].mxu0 }
 0x26d   : > { %v580_v26 = vmul.f32 0.044715, %v568_v21  ;;  %v572_v27 = vadd.f32 %v571_v25, %v515_v23  ;;  %v573_v28 = vpop.f32.mrb[3].mxu0  ;;  %v576_v55 = vmul.f32 0.5, %v568_v21 }
 0x26e   : > { %v581_v29 = vmul.f32 0.044715, %v570_v24  ;;  %v574_v30 = vadd.f32 %v573_v28, %v515_v23  ;;  %v577_v58 = vmul.f32 0.5, %v570_v24 }
 0x26f   : > { %v584_v31 = vmul.f32 %v580_v26, %v568_v21  ;;  %v582_v32 = vmul.f32 0.044715, %v572_v27  ;;  %v578_v56 = vmul.f32 0.5, %v572_v27 }
 0x270   : > { %v583_v33 = vmul.f32 0.044715, %v574_v30  ;;  %v585_v34 = vmul.f32 %v581_v29, %v570_v24  ;;  %v579_v59 = vmul.f32 0.5, %v574_v30 }
 0x271   : > { %v586_v35 = vmul.f32 %v582_v32, %v572_v27  ;;  %v588_v36 = vmul.f32 %v584_v31, %v568_v21 }
 0x272   : > { %v587_v37 = vmul.f32 %v583_v33, %v574_v30  ;;  %v589_v38 = vmul.f32 %v585_v34, %v570_v24 }
 0x273   : > { %v590_v39 = vmul.f32 %v586_v35, %v572_v27  ;;  %v592_v40 = vadd.f32 %v588_v36, %v568_v21 }
 0x274   : > { %v591_v41 = vmul.f32 %v587_v37, %v574_v30  ;;  %v593_v42 = vadd.f32 %v589_v38, %v570_v24 }
 0x275   : > { %v594_v43 = vadd.f32 %v590_v39, %v572_v27  ;;  %v596_v44 = vmul.f32 0.7978846, %v592_v40 }
 0x276   : > { %v595_v45 = vadd.f32 %v591_v41, %v574_v30  ;;  %v597_v46 = vmul.f32 0.7978846, %v593_v42 }
 0x277   : > { %v598_v47 = vmul.f32 0.7978846, %v594_v43  ;;  %1041 = vtanh.f32 %v596_v44 }
 0x278   : > { %v599_v48 = vmul.f32 0.7978846, %v595_v45  ;;  %1043 = vtanh.f32 %v597_v46 }
 0x279   : > { %1045 = vtanh.f32 %v598_v47 }
 0x27a   : > { %1047 = vtanh.f32 %v599_v48 }
 0x281   : > { %v1042_v49 = vpop.eup %1041 }
 0x282   : > { %v1044_v50 = vpop.eup %1043  ;;  %v604_v51 = vadd.f32 1.0, %v1042_v49 }
 0x283   : > { %v1046_v52 = vpop.eup %1045  ;;  %v605_v53 = vadd.f32 1.0, %v1044_v50 }
 0x284   : > { %v1048_v54 = vpop.eup %1047  ;;  %v606_v57 = vadd.f32 1.0, %v1046_v52  ;;  %v608_v61 = vmul.f32 %v604_v51, %v576_v55 }
 0x285   : > { %v607_v60 = vadd.f32 1.0, %v1048_v54  ;;  %v609_v63 = vmul.f32 %v605_v53, %v577_v58 }
 0x286   : > { %v610_v62 = vmul.f32 %v606_v57, %v578_v56 }
 0x287   : > { %v611_v0 = vmul.f32 %v607_v60, %v579_v59 }
 0x288   : > { %v612_v1 = vpack.c.bf16 %v610_v62, %v608_v61 }
 0x289   : > { %v613_v2 = vpack.c.bf16 %v611_v0, %v609_v63 }
 0x28b   : > { %625 = vmatprep.subr.bf16.mxu1 %v613_v2 }
 0x28c   : > { %626 = vmatpush1.bf16.msra.mxu1 %v612_v1 }
 0x28f   : > { %901 = vmatmul.mubr.msk.bf16.vlgmr.msra.gmra.mrb[0].mxu1 %vm621_vm2, %v614_v3 }
 0x362   : > { %v659_v5 = vpop.f32.mrb[0].mxu1 }
 0x363   : > { %v660_v6 = vadd.f32 %v659_v5, %v619_v4  ;;  %v661_v8 = vpop.f32.mrb[1].mxu1 }
 0x364   : > { %v662_v10 = vadd.f32 %v661_v8, %v619_v4  ;;  %v663_v11 = vpop.f32.mrb[2].mxu1 }
 0x365   : > { %v672_v12 = vmul.f32 %v670_v9, %v660_v6  ;;  %v664_v13 = vpop.f32.mrb[3].mxu1 }
 0x366   : > { %v673_v14 = vmul.f32 %v670_v9, %v662_v10 }
 0x368   : > { %v676_v15 = vcombine.low %v672_v12, %v673_v14 }
 0x36a   : > { %v678_v16 = vadd.f32 %v676_v15, %v1789_v7 }
 0x36c   : > { %679 = vst [vmem:[%s477_s30] sm:$0xff] %v678_v16 }
 0x36d   : > { %1292 = shalt.err (!%p1289_p3)
}
 0x36e   : > { %s1293_s3 = scalar_lea.hbm %s1801_s24, 128  ;;  %s1297_s23 = scalar_lea.hbm %s1923_s20, 256 }
 0x36f   : > { %p1294_p8 = scmp.ne.s32.totalorder %s1801_s24, %s1293_s3  ;;  %p1298_p7 = scmp.lt.u32.totalorder %s1801_s24, %s1923_s20 }
 0x370   : > { %p1299_p10 = scmp.lt.u32.totalorder %s1297_s23, %s1293_s3  ;;  %p1301_p1 = scmp.lt.u32.totalorder %s1293_s3, %s1801_s24 }
 0x371   : > { %p1295_p12 = pnand %p1294_p8, %p1924_p9 }
 0x372   : > { %p1300_p6 = por %p1299_p10, %p1298_p7 }
 0x373   : > { %p1296_p2 = pneg %p1295_p12 }
 0x374   : > { %p1302_p0 = por %p1301_p1, %p1300_p6 }
 0x376   : > { %p1303_p5 = pnand %p1302_p0, %p1296_p2 }
 0x378   : > { %1306 = shalt.err (!%p1303_p5)
}
 0x379   : > { %935 = dma.vmem_to_hbm [thread:$0]  (%p1924_p9), %s1803_s22, 128, %s1801_s24, %s681_s5  }
 0x37a PF: > { %s1925_s18 = sld [smem:[#allocation23_spill]]  ;;  %s1926_s8 = sld [smem:[#allocation30_spill]] }
 0x37b   : > { %s1927_s19 = sld [smem:[#allocation26_spill]] }
 0x380   : > { %s709_s16 = sand.u32 1, %s1925_s18   ;;  %p1928_p4 = scmp.ne.s32.totalorder %s1926_s8, 0 }
 0x381   : > { %p1929_p13 = scmp.ge.s32.totalorder %s1927_s19, 2  ;;  %s710_s11 = scalar_lea.sflag [#allocation4], %s709_s16 }
 0x383   : > { %p964_p11 = pnand %p1929_p13, %p1928_p4 }
 0x385   : > { %1352 = dma.done.wait (!%p964_p11), %s710_s11, 128  }
 0x386   : > { %1354 = vsyncadd (!%p964_p11), %s710_s11, 4294967168  ;;  %s30_s10 = sadd.s32 1, %s1927_s19   ;;  %s1930_s1 = sld [smem:[#allocation24_spill]] }
 0x387   : > { %p27_p3 = scmp.ge.s32.totalorder %s30_s10, 4   ;;  %s1931_s29 = sld [smem:[#allocation29_spill]] }
 0x388   : > { %s1932_s21 = sld [smem:[#allocation27_spill]]  ;;  %s1933_s27 = smov %s1361_s28 }
 0x389   : > { %s1935_s30 = smov %s1373_s9  ;;  %29 = sbr.rel (!%p27_p3) target bundleno = 16 (0x10), region = 141 }
 0x38c   : > { %s1934_s28 = smov %s1930_s1 }
 0x38e   : > { %s1936_s9 = smov %s1932_s21 }
 0x390   :  { %715 = vsyncpa [#allocation3], 1 }
 0x391   :  { %717 = vsyncpa [#allocation3 + $0x1], 1 }
 0x392   :  { %718 = vsyncpa [#allocation6], 1 }
 0x393   :  { %720 = vsyncpa [#allocation6 + $0x1], 1 }
 0x394   :  { %721 = vsyncpa [#allocation9], 1 }
 0x395   :  { %722 = vsyncpa [#allocation12], 1 }
 0x396   :  { %723 = vsyncpa [#allocation15], 1 }
 0x397   :  { %724 = vsyncpa [#allocation4], 1 }
 0x398   :  { %726 = vsyncpa [#allocation4 + $0x1], 1 }

</bundles_post_ra>
